<compile_context>
chip_gen: v5e
topology: v5e:2x2
jax: 0.10.0
libtpu: 0.0.40
codegen_flags: <defaults>
</compile_context>

<pallas_src>
import jax
import jax.numpy as jnp
from jax import lax
from jax.experimental import pallas as pl
from jax.experimental.pallas import tpu as pltpu

# ----------------------------- configuration --------------------------------
NUM_TARGET = 16          # number of target-type nodes (the metapath graph nodes)
NUM_OTHER = 6            # nodes of a second type (in_size == 1 -> zero features)
IN_SIZES = {"target": 12, "other": 1}
FEAT_PROJ = 24           # feat_proj_size
HIDDEN = 8               # hidden_size
NUM_HEADS = (2, 2)       # num_heads per layer
OUT_SIZE = 4             # out_size
NUM_METAPATHS = 2
SEM_DIM = 16             # semantic-attention hidden dim

NEG_INF = -1e30          # Python float -> becomes a literal (no captured jax const)
LEAKY_SLOPE = 0.2        # DGL GATConv default negative_slope


# ------------------------------- helpers -------------------------------------
def _full_spec(shape):
    nd = len(shape)
    return pl.BlockSpec(shape, lambda i, _nd=nd: (0,) * _nd)


def _elu(x):
    # ELU(x) = x if x > 0 else exp(x) - 1   (exp instead of expm1 for safe lowering)
    return jnp.where(x > 0, x, jnp.exp(jnp.minimum(x, 0.0)) - 1.0)


# --------------------------- fused kernel body --------------------------------
def _gat_metapaths(z_all, er_all, el_rows, adj, hm_ref, *, num_mp, num_heads,
                   head_dim):
    """Multi-head GAT per metapath; writes (N, H*D) for metapath m into hm_ref[m]."""
    for m in range(num_mp):
        edge = adj[m] > 0.0
        for hh in range(num_heads):
            idx = m * num_heads + hh
            zh = z_all[:, idx * head_dim:(idx + 1) * head_dim]      # (N, D)
            er = er_all[:, idx:idx + 1]                             # (N, 1) dst term
            el = el_rows[idx:idx + 1, :]                            # (1, N) src term
            e = er + el                                             # e[i,j]=ar.z_i+al.z_j
            e = jnp.where(e > 0, e, LEAKY_SLOPE * e)                # leaky_relu
            e = jnp.where(edge, e, NEG_INF)
            mrow = jnp.max(e, axis=-1, keepdims=True)
            p = jnp.where(edge, jnp.exp(e - mrow), 0.0)
            denom = jnp.maximum(jnp.sum(p, axis=-1, keepdims=True), 1e-30)
            alpha = p / denom                                       # softmax over nbrs
            hm_ref[m, :, hh * head_dim:(hh + 1) * head_dim] = jnp.dot(
                alpha, zh, preferred_element_type=jnp.float32)      # (N, D)


def _semantic_attention(hm_ref, sem_w, sem_b, sem_q, *, num_mp):
    """Softmax over per-metapath summaries, weighted combine -> (N, H*D)."""
    scores = []
    for m in range(num_mp):
        proj = jnp.tanh(
            jnp.dot(hm_ref[m], sem_w, preferred_element_type=jnp.float32) + sem_b)
        scores.append(jnp.mean(
            jnp.dot(proj, sem_q, preferred_element_type=jnp.float32),
            keepdims=True))                                         # (1, 1)
    mmax = scores[0]
    for s in scores[1:]:
        mmax = jnp.maximum(mmax, s)
    exps = [jnp.exp(s - mmax) for s in scores]
    denom = exps[0]
    for e in exps[1:]:
        denom = denom + e
    out = (exps[0] / denom) * hm_ref[0]
    for m in range(1, num_mp):
        out = out + (exps[m] / denom) * hm_ref[m]
    return out


def _han_kernel(feat_ref, adj_ref,
                proj_w_ref, proj_b_ref,
                gw0_ref, al0_ref, ar0_ref, sw0_ref, sb0_ref, sq0_ref,
                gw1_ref, al1_ref, ar1_ref, sw1_ref, sb1_ref, sq1_ref,
                res_w_ref, pred_w_ref, pred_b_ref,
                o_ref, hm_ref):
    adj = adj_ref[...]                                              # (M, N, N)

    # ---- per-node-type feature projection (target ntype; 12 != 24 -> Linear) ----
    h = (jnp.dot(feat_ref[...], proj_w_ref[...],
                 preferred_element_type=jnp.float32) + proj_b_ref[...])

    layer_refs = (
        (gw0_ref, al0_ref, ar0_ref, sw0_ref, sb0_ref, sq0_ref),
        (gw1_ref, al1_ref, ar1_ref, sw1_ref, sb1_ref, sq1_ref),
    )
    for layer_id, (gw, alm, arm, sw, sb, sq) in enumerate(layer_refs):
        nh = NUM_HEADS[layer_id]
        resval = h
        # batched projection for all metapaths+heads: (N, M*H*D) in one matmul
        z_all = jnp.dot(h, gw[...], preferred_element_type=jnp.float32)
        # dst attention terms (N, M*H) via block-diag matrix
        er_all = jnp.dot(z_all, arm[...], preferred_element_type=jnp.float32)
        # src attention terms produced directly lane-major as (M*H, N): no transpose
        el_rows = lax.dot_general(alm[...], z_all,
                                  dimension_numbers=(((1,), (1,)), ((), ())),
                                  preferred_element_type=jnp.float32)
        # per-metapath multi-head GAT -> hm_ref[m] = (N, H*D)
        _gat_metapaths(z_all, er_all, el_rows, adj, hm_ref,
                       num_mp=NUM_METAPATHS, num_heads=nh, head_dim=HIDDEN)
        # semantic attention across metapaths
        h_new = _semantic_attention(hm_ref, sw[...], sb[...], sq[...],
                                    num_mp=NUM_METAPATHS)
        # residual (residual=True => conv activation None, then ELU here);
        # res_fc only when shapes differ (layer 0: FEAT_PROJ -> H*D)
        if resval.shape != h_new.shape:
            res = jnp.dot(resval, res_w_ref[...],
                          preferred_element_type=jnp.float32)
        else:
            res = resval
        h = _elu(h_new + res)
        # normalize=False -> no LayerNorm

    # predict=True, softmax=False -> sigmoid(Linear(h))
    logits = (jnp.dot(h, pred_w_ref[...], preferred_element_type=jnp.float32)
              + pred_b_ref[...])
    o_ref[...] = 1.0 / (1.0 + jnp.exp(-logits))


# ------------------------------ wrapper ----------------------------------------
def han_forward(params, feats, adjs):
    # 'other' ntype (in_size==1) projects to zero features; with full_feature_set=False
    # and a GAT-style conv it never reaches the target-node path, so it is not an
    # input to the kernel (matches the original forward semantics).
    n = feats["target"].shape[0]
    hd = HIDDEN * NUM_HEADS[-1]

    inputs = (
        feats["target"], adjs,
        params["proj_w"], params["proj_b"],
        params["gat_w_0"], params["attn_l_mat_0"], params["attn_r_mat_0"],
        params["sem_w_0"], params["sem_b_0"], params["sem_q_0"],
        params["gat_w_1"], params["attn_l_mat_1"], params["attn_r_mat_1"],
        params["sem_w_1"], params["sem_b_1"], params["sem_q_1"],
        params["res_w"], params["pred_w"], params["pred_b"],
    )
    return pl.pallas_call(
        _han_kernel,
        out_shape=jax.ShapeDtypeStruct((n, OUT_SIZE), jnp.float32),
        grid=(1,),
        in_specs=[_full_spec(x.shape) for x in inputs],
        out_specs=_full_spec((n, OUT_SIZE)),
        scratch_shapes=[pltpu.VMEM((NUM_METAPATHS, n, hd), jnp.float32)],
    )(*inputs)


# ------------------------------ params -----------------------------------------
def _attn_block_mat(key, num_mp, num_heads, head_dim, scale):
    """Random per-(metapath, head) attention vectors laid out as a block matrix
    of shape (M*H, M*H*D): row m*H+h holds attn vec in cols [(m*H+h)*D, ...)."""
    a = scale * jax.random.normal(key, (num_mp * num_heads, head_dim), jnp.float32)
    mat = jnp.zeros((num_mp * num_heads, num_mp * num_heads * head_dim), jnp.float32)
    for i in range(num_mp * num_heads):
        mat = mat.at[i, i * head_dim:(i + 1) * head_dim].set(a[i])
    return mat


def init_params(key):
    ks = iter(jax.random.split(key, 32))
    scale = 0.2

    def rnd(shape):
        return scale * jax.random.normal(next(ks), shape, dtype=jnp.float32)

    params = {
        # feature projection for 'target' ntype (in_size 12 != feat_proj 24 -> Linear)
        "proj_w": rnd((IN_SIZES["target"], FEAT_PROJ)),
        "proj_b": rnd((1, FEAT_PROJ)),
        # residual projection: Linear(feat_proj, hidden*num_heads[-1], bias=False)
        "res_w": rnd((FEAT_PROJ, HIDDEN * NUM_HEADS[-1])),
        # prediction head
        "pred_w": rnd((HIDDEN * NUM_HEADS[-1], OUT_SIZE)),
        "pred_b": rnd((1, OUT_SIZE)),
    }
    layer_in = FEAT_PROJ
    for l, nh in enumerate(NUM_HEADS):
        hd = nh * HIDDEN
        mhd = NUM_METAPATHS * hd
        # all metapaths' GAT weights concatenated along the output dim
        params[f"gat_w_{l}"] = rnd((layer_in, mhd))
        # src-attention as (M*H, M*H*D) rows; dst-attention as (M*H*D, M*H) cols
        params[f"attn_l_mat_{l}"] = _attn_block_mat(next(ks), NUM_METAPATHS, nh,
                                                    HIDDEN, scale)
        params[f"attn_r_mat_{l}"] = _attn_block_mat(next(ks), NUM_METAPATHS, nh,
                                                    HIDDEN, scale).T
        params[f"sem_w_{l}"] = rnd((hd, SEM_DIM))
        params[f"sem_b_{l}"] = rnd((1, SEM_DIM))
        params[f"sem_q_{l}"] = rnd((SEM_DIM, 1))
        layer_in = hd
    return params


# ------------------------------ main --------------------------------------------
if __name__ == "__main__":
    key = jax.random.PRNGKey(0)
    k_params, k_ft, k_fo, k_adj = jax.random.split(key, 4)

    params = init_params(k_params)

    feats = {
        "target": jax.random.normal(k_ft, (NUM_TARGET, IN_SIZES["target"]),
                                    dtype=jnp.float32),
        "other": jax.random.normal(k_fo, (NUM_OTHER, IN_SIZES["other"]),
                                   dtype=jnp.float32),
    }

    # dense metapath-induced adjacency over target nodes, with self-loops
    adj_rand = jax.random.bernoulli(
        k_adj, 0.3, (NUM_METAPATHS, NUM_TARGET, NUM_TARGET)).astype(jnp.float32)
    adjs = jnp.maximum(adj_rand, jnp.eye(NUM_TARGET, dtype=jnp.float32)[None])

    out = han_forward(params, feats, adjs)
    out = jax.block_until_ready(out)

    assert out.shape == (NUM_TARGET, OUT_SIZE), out.shape
    assert bool(jnp.all(jnp.isfinite(out)))
    assert bool(jnp.all((out >= 0.0) & (out <= 1.0)))  # sigmoid output range
    print("KERNEL_OK")
</pallas_src>

<mosaic_0001>
module attributes {stable_mosaic.version = 11 : i64} {
  func.func @_han_kernel(%arg0: i32, %arg1: memref<16x12xf32, #tpu.memory_space<vmem>>, %arg2: memref<2x16x16xf32, #tpu.memory_space<vmem>>, %arg3: memref<12x24xf32, #tpu.memory_space<vmem>>, %arg4: memref<1x24xf32, #tpu.memory_space<vmem>>, %arg5: memref<24x32xf32, #tpu.memory_space<vmem>>, %arg6: memref<4x32xf32, #tpu.memory_space<vmem>>, %arg7: memref<32x4xf32, #tpu.memory_space<vmem>>, %arg8: memref<16x16xf32, #tpu.memory_space<vmem>>, %arg9: memref<1x16xf32, #tpu.memory_space<vmem>>, %arg10: memref<16x1xf32, #tpu.memory_space<vmem>>, %arg11: memref<16x32xf32, #tpu.memory_space<vmem>>, %arg12: memref<4x32xf32, #tpu.memory_space<vmem>>, %arg13: memref<32x4xf32, #tpu.memory_space<vmem>>, %arg14: memref<16x16xf32, #tpu.memory_space<vmem>>, %arg15: memref<1x16xf32, #tpu.memory_space<vmem>>, %arg16: memref<16x1xf32, #tpu.memory_space<vmem>>, %arg17: memref<24x16xf32, #tpu.memory_space<vmem>>, %arg18: memref<16x4xf32, #tpu.memory_space<vmem>>, %arg19: memref<1x4xf32, #tpu.memory_space<vmem>>, %arg20: memref<16x4xf32, #tpu.memory_space<vmem>>, %arg21: memref<2x16x16xf32, #tpu.memory_space<vmem>>) attributes {dimension_semantics = [#tpu.dimension_semantics<arbitrary>], iteration_bounds = array<i64: 1>, scalar_prefetch = 0 : i64, scratch_operands = 1 : i64, tpu.core_type = #tpu.core_type<tc>, window_params = [{pipeline_mode = #tpu.pipeline_mode<synchronous>, transform_indices = @transform_0, window_bounds = array<i64: 16, 12>}, {pipeline_mode = #tpu.pipeline_mode<synchronous>, transform_indices = @transform_1, window_bounds = array<i64: 2, 16, 16>}, {pipeline_mode = #tpu.pipeline_mode<synchronous>, transform_indices = @transform_2, window_bounds = array<i64: 12, 24>}, {pipeline_mode = #tpu.pipeline_mode<synchronous>, transform_indices = @transform_3, window_bounds = array<i64: 1, 24>}, {pipeline_mode = #tpu.pipeline_mode<synchronous>, transform_indices = @transform_4, window_bounds = array<i64: 24, 32>}, {pipeline_mode = #tpu.pipeline_mode<synchronous>, transform_indices = @transform_5, window_bounds = array<i64: 4, 32>}, {pipeline_mode = #tpu.pipeline_mode<synchronous>, transform_indices = @transform_6, window_bounds = array<i64: 32, 4>}, {pipeline_mode = #tpu.pipeline_mode<synchronous>, transform_indices = @transform_7, window_bounds = array<i64: 16, 16>}, {pipeline_mode = #tpu.pipeline_mode<synchronous>, transform_indices = @transform_8, window_bounds = array<i64: 1, 16>}, {pipeline_mode = #tpu.pipeline_mode<synchronous>, transform_indices = @transform_9, window_bounds = array<i64: 16, 1>}, {pipeline_mode = #tpu.pipeline_mode<synchronous>, transform_indices = @transform_10, window_bounds = array<i64: 16, 32>}, {pipeline_mode = #tpu.pipeline_mode<synchronous>, transform_indices = @transform_11, window_bounds = array<i64: 4, 32>}, {pipeline_mode = #tpu.pipeline_mode<synchronous>, transform_indices = @transform_12, window_bounds = array<i64: 32, 4>}, {pipeline_mode = #tpu.pipeline_mode<synchronous>, transform_indices = @transform_13, window_bounds = array<i64: 16, 16>}, {pipeline_mode = #tpu.pipeline_mode<synchronous>, transform_indices = @transform_14, window_bounds = array<i64: 1, 16>}, {pipeline_mode = #tpu.pipeline_mode<synchronous>, transform_indices = @transform_15, window_bounds = array<i64: 16, 1>}, {pipeline_mode = #tpu.pipeline_mode<synchronous>, transform_indices = @transform_16, window_bounds = array<i64: 24, 16>}, {pipeline_mode = #tpu.pipeline_mode<synchronous>, transform_indices = @transform_17, window_bounds = array<i64: 16, 4>}, {pipeline_mode = #tpu.pipeline_mode<synchronous>, transform_indices = @transform_18, window_bounds = array<i64: 1, 4>}, {pipeline_mode = #tpu.pipeline_mode<synchronous>, transform_indices = @transform_19, window_bounds = array<i64: 16, 4>}]} {
    %c0 = arith.constant 0 : index
    %c0_0 = arith.constant 0 : index
    %c0_1 = arith.constant 0 : index
    %0 = vector.load %arg2[%c0, %c0_0, %c0_1] : memref<2x16x16xf32, #tpu.memory_space<vmem>>, vector<2x16x16xf32>
    %c0_2 = arith.constant 0 : index
    %c0_3 = arith.constant 0 : index
    %1 = vector.load %arg1[%c0_2, %c0_3] : memref<16x12xf32, #tpu.memory_space<vmem>>, vector<16x12xf32>
    %c0_4 = arith.constant 0 : index
    %c0_5 = arith.constant 0 : index
    %2 = vector.load %arg3[%c0_4, %c0_5] : memref<12x24xf32, #tpu.memory_space<vmem>>, vector<12x24xf32>
    %cst = arith.constant dense<0.000000e+00> : vector<16x24xf32>
    %3 = tpu.matmul %1, %2, %cst {dimension_numbers = #tpu.dot_dimension_numbers<[1], [0], [0], [1], [0, 0, 1, 1], [], []>} : vector<16x12xf32>, vector<12x24xf32>, vector<16x24xf32> -> vector<16x24xf32>
    %c0_6 = arith.constant 0 : index
    %c0_7 = arith.constant 0 : index
    %4 = vector.load %arg4[%c0_6, %c0_7] : memref<1x24xf32, #tpu.memory_space<vmem>>, vector<1x24xf32>
    %5 = vector.broadcast %4 : vector<1x24xf32> to vector<16x24xf32>
    %6 = arith.addf %3, %5 : vector<16x24xf32>
    %c0_8 = arith.constant 0 : index
    %c0_9 = arith.constant 0 : index
    %7 = vector.load %arg5[%c0_8, %c0_9] : memref<24x32xf32, #tpu.memory_space<vmem>>, vector<24x32xf32>
    %cst_10 = arith.constant dense<0.000000e+00> : vector<16x32xf32>
    %8 = tpu.matmul %6, %7, %cst_10 {dimension_numbers = #tpu.dot_dimension_numbers<[1], [0], [0], [1], [0, 0, 1, 1], [], []>} : vector<16x24xf32>, vector<24x32xf32>, vector<16x32xf32> -> vector<16x32xf32>
    %c0_11 = arith.constant 0 : index
    %c0_12 = arith.constant 0 : index
    %9 = vector.load %arg7[%c0_11, %c0_12] : memref<32x4xf32, #tpu.memory_space<vmem>>, vector<32x4xf32>
    %cst_13 = arith.constant dense<0.000000e+00> : vector<16x4xf32>
    %10 = tpu.matmul %8, %9, %cst_13 {dimension_numbers = #tpu.dot_dimension_numbers<[1], [0], [0], [1], [0, 0, 1, 1], [], []>} : vector<16x32xf32>, vector<32x4xf32>, vector<16x4xf32> -> vector<16x4xf32>
    %c0_14 = arith.constant 0 : index
    %c0_15 = arith.constant 0 : index
    %11 = vector.load %arg6[%c0_14, %c0_15] : memref<4x32xf32, #tpu.memory_space<vmem>>, vector<4x32xf32>
    %cst_16 = arith.constant dense<0.000000e+00> : vector<4x16xf32>
    %12 = tpu.matmul %11, %8, %cst_16 {dimension_numbers = #tpu.dot_dimension_numbers<[1], [1], [0], [0], [0, 0, 1, 0], [], []>} : vector<4x32xf32>, vector<16x32xf32>, vector<4x16xf32> -> vector<4x16xf32>
    %13 = vector.extract_strided_slice %0 {offsets = [0, 0, 0], sizes = [1, 16, 16], strides = [1, 1, 1]} : vector<2x16x16xf32> to vector<1x16x16xf32>
    %14 = vector.shape_cast %13 : vector<1x16x16xf32> to vector<16x16xf32>
    %cst_17 = arith.constant 0.000000e+00 : f32
    %15 = vector.broadcast %cst_17 : f32 to vector<16x16xf32>
    %16 = arith.cmpf ogt, %14, %15 : vector<16x16xf32>
    %17 = vector.extract_strided_slice %8 {offsets = [0, 0], sizes = [16, 8], strides = [1, 1]} : vector<16x32xf32> to vector<16x8xf32>
    %18 = vector.extract_strided_slice %10 {offsets = [0, 0], sizes = [16, 1], strides = [1, 1]} : vector<16x4xf32> to vector<16x1xf32>
    %19 = vector.extract_strided_slice %12 {offsets = [0, 0], sizes = [1, 16], strides = [1, 1]} : vector<4x16xf32> to vector<1x16xf32>
    %20 = vector.broadcast %18 : vector<16x1xf32> to vector<16x16xf32>
    %21 = vector.broadcast %19 : vector<1x16xf32> to vector<16x16xf32>
    %22 = arith.addf %20, %21 : vector<16x16xf32>
    %cst_18 = arith.constant 0.000000e+00 : f32
    %23 = vector.broadcast %cst_18 : f32 to vector<16x16xf32>
    %24 = arith.cmpf ogt, %22, %23 : vector<16x16xf32>
    %cst_19 = arith.constant 2.000000e-01 : f32
    %25 = vector.broadcast %cst_19 : f32 to vector<16x16xf32>
    %26 = arith.mulf %25, %22 : vector<16x16xf32>
    %27 = arith.select %24, %22, %26 : vector<16x16xi1>, vector<16x16xf32>
    %cst_20 = arith.constant -1.000000e+30 : f32
    %28 = vector.broadcast %cst_20 : f32 to vector<16x16xf32>
    %29 = arith.select %16, %27, %28 : vector<16x16xi1>, vector<16x16xf32>
    %cst_21 = arith.constant dense<0xFF800000> : vector<16xf32>
    %30 = vector.multi_reduction <maximumf>, %29, %cst_21 [1] : vector<16x16xf32> to vector<16xf32>
    %31 = vector.shape_cast %30 : vector<16xf32> to vector<16x1xf32>
    %32 = vector.broadcast %31 : vector<16x1xf32> to vector<16x16xf32>
    %33 = arith.subf %29, %32 : vector<16x16xf32>
    %34 = math.exp %33 : vector<16x16xf32>
    %cst_22 = arith.constant 0.000000e+00 : f32
    %35 = vector.broadcast %cst_22 : f32 to vector<16x16xf32>
    %36 = arith.select %16, %34, %35 : vector<16x16xi1>, vector<16x16xf32>
    %cst_23 = arith.constant dense<0.000000e+00> : vector<16xf32>
    %37 = vector.multi_reduction <add>, %36, %cst_23 [1] : vector<16x16xf32> to vector<16xf32>
    %38 = vector.shape_cast %37 : vector<16xf32> to vector<16x1xf32>
    %cst_24 = arith.constant 1.000000e-30 : f32
    %39 = vector.broadcast %cst_24 : f32 to vector<16x1xf32>
    %40 = arith.maximumf %38, %39 : vector<16x1xf32>
    %41 = vector.broadcast %40 : vector<16x1xf32> to vector<16x16xf32>
    %42 = arith.divf %36, %41 : vector<16x16xf32>
    %cst_25 = arith.constant dense<0.000000e+00> : vector<16x8xf32>
    %43 = tpu.matmul %42, %17, %cst_25 {dimension_numbers = #tpu.dot_dimension_numbers<[1], [0], [0], [1], [0, 0, 1, 1], [], []>} : vector<16x16xf32>, vector<16x8xf32>, vector<16x8xf32> -> vector<16x8xf32>
    %c0_26 = arith.constant 0 : index
    %c0_27 = arith.constant 0 : index
    %c0_28 = arith.constant 0 : index
    %44 = vector.load %arg21[%c0_26, %c0_27, %c0_28] : memref<2x16x16xf32, #tpu.memory_space<vmem>>, vector<1x16x8xf32>
    %45 = vector.shape_cast %44 : vector<1x16x8xf32> to vector<16x8xf32>
    %46 = vector.shape_cast %43 : vector<16x8xf32> to vector<1x16x8xf32>
    tpu.vector_store %arg21[%c0_26, %c0_27, %c0_28], %46 {strides = array<i32>} : memref<2x16x16xf32, #tpu.memory_space<vmem>>, vector<1x16x8xf32>,
    %47 = vector.extract_strided_slice %8 {offsets = [0, 8], sizes = [16, 8], strides = [1, 1]} : vector<16x32xf32> to vector<16x8xf32>
    %48 = vector.extract_strided_slice %10 {offsets = [0, 1], sizes = [16, 1], strides = [1, 1]} : vector<16x4xf32> to vector<16x1xf32>
    %49 = vector.extract_strided_slice %12 {offsets = [1, 0], sizes = [1, 16], strides = [1, 1]} : vector<4x16xf32> to vector<1x16xf32>
    %50 = vector.broadcast %48 : vector<16x1xf32> to vector<16x16xf32>
    %51 = vector.broadcast %49 : vector<1x16xf32> to vector<16x16xf32>
    %52 = arith.addf %50, %51 : vector<16x16xf32>
    %cst_29 = arith.constant 0.000000e+00 : f32
    %53 = vector.broadcast %cst_29 : f32 to vector<16x16xf32>
    %54 = arith.cmpf ogt, %52, %53 : vector<16x16xf32>
    %cst_30 = arith.constant 2.000000e-01 : f32
    %55 = vector.broadcast %cst_30 : f32 to vector<16x16xf32>
    %56 = arith.mulf %55, %52 : vector<16x16xf32>
    %57 = arith.select %54, %52, %56 : vector<16x16xi1>, vector<16x16xf32>
    %cst_31 = arith.constant -1.000000e+30 : f32
    %58 = vector.broadcast %cst_31 : f32 to vector<16x16xf32>
    %59 = arith.select %16, %57, %58 : vector<16x16xi1>, vector<16x16xf32>
    %cst_32 = arith.constant dense<0xFF800000> : vector<16xf32>
    %60 = vector.multi_reduction <maximumf>, %59, %cst_32 [1] : vector<16x16xf32> to vector<16xf32>
    %61 = vector.shape_cast %60 : vector<16xf32> to vector<16x1xf32>
    %62 = vector.broadcast %61 : vector<16x1xf32> to vector<16x16xf32>
    %63 = arith.subf %59, %62 : vector<16x16xf32>
    %64 = math.exp %63 : vector<16x16xf32>
    %cst_33 = arith.constant 0.000000e+00 : f32
    %65 = vector.broadcast %cst_33 : f32 to vector<16x16xf32>
    %66 = arith.select %16, %64, %65 : vector<16x16xi1>, vector<16x16xf32>
    %cst_34 = arith.constant dense<0.000000e+00> : vector<16xf32>
    %67 = vector.multi_reduction <add>, %66, %cst_34 [1] : vector<16x16xf32> to vector<16xf32>
    %68 = vector.shape_cast %67 : vector<16xf32> to vector<16x1xf32>
    %cst_35 = arith.constant 1.000000e-30 : f32
    %69 = vector.broadcast %cst_35 : f32 to vector<16x1xf32>
    %70 = arith.maximumf %68, %69 : vector<16x1xf32>
    %71 = vector.broadcast %70 : vector<16x1xf32> to vector<16x16xf32>
    %72 = arith.divf %66, %71 : vector<16x16xf32>
    %cst_36 = arith.constant dense<0.000000e+00> : vector<16x8xf32>
    %73 = tpu.matmul %72, %47, %cst_36 {dimension_numbers = #tpu.dot_dimension_numbers<[1], [0], [0], [1], [0, 0, 1, 1], [], []>} : vector<16x16xf32>, vector<16x8xf32>, vector<16x8xf32> -> vector<16x8xf32>
    %c0_37 = arith.constant 0 : index
    %c0_38 = arith.constant 0 : index
    %c8 = arith.constant 8 : index
    %74 = vector.load %arg21[%c0_37, %c0_38, %c8] : memref<2x16x16xf32, #tpu.memory_space<vmem>>, vector<1x16x8xf32>
    %75 = vector.shape_cast %74 : vector<1x16x8xf32> to vector<16x8xf32>
    %76 = vector.shape_cast %73 : vector<16x8xf32> to vector<1x16x8xf32>
    tpu.vector_store %arg21[%c0_37, %c0_38, %c8], %76 {strides = array<i32>} : memref<2x16x16xf32, #tpu.memory_space<vmem>>, vector<1x16x8xf32>,
    %77 = vector.extract_strided_slice %0 {offsets = [1, 0, 0], sizes = [1, 16, 16], strides = [1, 1, 1]} : vector<2x16x16xf32> to vector<1x16x16xf32>
    %78 = vector.shape_cast %77 : vector<1x16x16xf32> to vector<16x16xf32>
    %cst_39 = arith.constant 0.000000e+00 : f32
    %79 = vector.broadcast %cst_39 : f32 to vector<16x16xf32>
    %80 = arith.cmpf ogt, %78, %79 : vector<16x16xf32>
    %81 = vector.extract_strided_slice %8 {offsets = [0, 16], sizes = [16, 8], strides = [1, 1]} : vector<16x32xf32> to vector<16x8xf32>
    %82 = vector.extract_strided_slice %10 {offsets = [0, 2], sizes = [16, 1], strides = [1, 1]} : vector<16x4xf32> to vector<16x1xf32>
    %83 = vector.extract_strided_slice %12 {offsets = [2, 0], sizes = [1, 16], strides = [1, 1]} : vector<4x16xf32> to vector<1x16xf32>
    %84 = vector.broadcast %82 : vector<16x1xf32> to vector<16x16xf32>
    %85 = vector.broadcast %83 : vector<1x16xf32> to vector<16x16xf32>
    %86 = arith.addf %84, %85 : vector<16x16xf32>
    %cst_40 = arith.constant 0.000000e+00 : f32
    %87 = vector.broadcast %cst_40 : f32 to vector<16x16xf32>
    %88 = arith.cmpf ogt, %86, %87 : vector<16x16xf32>
    %cst_41 = arith.constant 2.000000e-01 : f32
    %89 = vector.broadcast %cst_41 : f32 to vector<16x16xf32>
    %90 = arith.mulf %89, %86 : vector<16x16xf32>
    %91 = arith.select %88, %86, %90 : vector<16x16xi1>, vector<16x16xf32>
    %cst_42 = arith.constant -1.000000e+30 : f32
    %92 = vector.broadcast %cst_42 : f32 to vector<16x16xf32>
    %93 = arith.select %80, %91, %92 : vector<16x16xi1>, vector<16x16xf32>
    %cst_43 = arith.constant dense<0xFF800000> : vector<16xf32>
    %94 = vector.multi_reduction <maximumf>, %93, %cst_43 [1] : vector<16x16xf32> to vector<16xf32>
    %95 = vector.shape_cast %94 : vector<16xf32> to vector<16x1xf32>
    %96 = vector.broadcast %95 : vector<16x1xf32> to vector<16x16xf32>
    %97 = arith.subf %93, %96 : vector<16x16xf32>
    %98 = math.exp %97 : vector<16x16xf32>
    %cst_44 = arith.constant 0.000000e+00 : f32
    %99 = vector.broadcast %cst_44 : f32 to vector<16x16xf32>
    %100 = arith.select %80, %98, %99 : vector<16x16xi1>, vector<16x16xf32>
    %cst_45 = arith.constant dense<0.000000e+00> : vector<16xf32>
    %101 = vector.multi_reduction <add>, %100, %cst_45 [1] : vector<16x16xf32> to vector<16xf32>
    %102 = vector.shape_cast %101 : vector<16xf32> to vector<16x1xf32>
    %cst_46 = arith.constant 1.000000e-30 : f32
    %103 = vector.broadcast %cst_46 : f32 to vector<16x1xf32>
    %104 = arith.maximumf %102, %103 : vector<16x1xf32>
    %105 = vector.broadcast %104 : vector<16x1xf32> to vector<16x16xf32>
    %106 = arith.divf %100, %105 : vector<16x16xf32>
    %cst_47 = arith.constant dense<0.000000e+00> : vector<16x8xf32>
    %107 = tpu.matmul %106, %81, %cst_47 {dimension_numbers = #tpu.dot_dimension_numbers<[1], [0], [0], [1], [0, 0, 1, 1], [], []>} : vector<16x16xf32>, vector<16x8xf32>, vector<16x8xf32> -> vector<16x8xf32>
    %c1 = arith.constant 1 : index
    %c0_48 = arith.constant 0 : index
    %c0_49 = arith.constant 0 : index
    %108 = vector.load %arg21[%c1, %c0_48, %c0_49] : memref<2x16x16xf32, #tpu.memory_space<vmem>>, vector<1x16x8xf32>
    %109 = vector.shape_cast %108 : vector<1x16x8xf32> to vector<16x8xf32>
    %110 = vector.shape_cast %107 : vector<16x8xf32> to vector<1x16x8xf32>
    tpu.vector_store %arg21[%c1, %c0_48, %c0_49], %110 {strides = array<i32>} : memref<2x16x16xf32, #tpu.memory_space<vmem>>, vector<1x16x8xf32>,
    %111 = vector.extract_strided_slice %8 {offsets = [0, 24], sizes = [16, 8], strides = [1, 1]} : vector<16x32xf32> to vector<16x8xf32>
    %112 = vector.extract_strided_slice %10 {offsets = [0, 3], sizes = [16, 1], strides = [1, 1]} : vector<16x4xf32> to vector<16x1xf32>
    %113 = vector.extract_strided_slice %12 {offsets = [3, 0], sizes = [1, 16], strides = [1, 1]} : vector<4x16xf32> to vector<1x16xf32>
    %114 = vector.broadcast %112 : vector<16x1xf32> to vector<16x16xf32>
    %115 = vector.broadcast %113 : vector<1x16xf32> to vector<16x16xf32>
    %116 = arith.addf %114, %115 : vector<16x16xf32>
    %cst_50 = arith.constant 0.000000e+00 : f32
    %117 = vector.broadcast %cst_50 : f32 to vector<16x16xf32>
    %118 = arith.cmpf ogt, %116, %117 : vector<16x16xf32>
    %cst_51 = arith.constant 2.000000e-01 : f32
    %119 = vector.broadcast %cst_51 : f32 to vector<16x16xf32>
    %120 = arith.mulf %119, %116 : vector<16x16xf32>
    %121 = arith.select %118, %116, %120 : vector<16x16xi1>, vector<16x16xf32>
    %cst_52 = arith.constant -1.000000e+30 : f32
    %122 = vector.broadcast %cst_52 : f32 to vector<16x16xf32>
    %123 = arith.select %80, %121, %122 : vector<16x16xi1>, vector<16x16xf32>
    %cst_53 = arith.constant dense<0xFF800000> : vector<16xf32>
    %124 = vector.multi_reduction <maximumf>, %123, %cst_53 [1] : vector<16x16xf32> to vector<16xf32>
    %125 = vector.shape_cast %124 : vector<16xf32> to vector<16x1xf32>
    %126 = vector.broadcast %125 : vector<16x1xf32> to vector<16x16xf32>
    %127 = arith.subf %123, %126 : vector<16x16xf32>
    %128 = math.exp %127 : vector<16x16xf32>
    %cst_54 = arith.constant 0.000000e+00 : f32
    %129 = vector.broadcast %cst_54 : f32 to vector<16x16xf32>
    %130 = arith.select %80, %128, %129 : vector<16x16xi1>, vector<16x16xf32>
    %cst_55 = arith.constant dense<0.000000e+00> : vector<16xf32>
    %131 = vector.multi_reduction <add>, %130, %cst_55 [1] : vector<16x16xf32> to vector<16xf32>
    %132 = vector.shape_cast %131 : vector<16xf32> to vector<16x1xf32>
    %cst_56 = arith.constant 1.000000e-30 : f32
    %133 = vector.broadcast %cst_56 : f32 to vector<16x1xf32>
    %134 = arith.maximumf %132, %133 : vector<16x1xf32>
    %135 = vector.broadcast %134 : vector<16x1xf32> to vector<16x16xf32>
    %136 = arith.divf %130, %135 : vector<16x16xf32>
    %cst_57 = arith.constant dense<0.000000e+00> : vector<16x8xf32>
    %137 = tpu.matmul %136, %111, %cst_57 {dimension_numbers = #tpu.dot_dimension_numbers<[1], [0], [0], [1], [0, 0, 1, 1], [], []>} : vector<16x16xf32>, vector<16x8xf32>, vector<16x8xf32> -> vector<16x8xf32>
    %c1_58 = arith.constant 1 : index
    %c0_59 = arith.constant 0 : index
    %c8_60 = arith.constant 8 : index
    %138 = vector.load %arg21[%c1_58, %c0_59, %c8_60] : memref<2x16x16xf32, #tpu.memory_space<vmem>>, vector<1x16x8xf32>
    %139 = vector.shape_cast %138 : vector<1x16x8xf32> to vector<16x8xf32>
    %140 = vector.shape_cast %137 : vector<16x8xf32> to vector<1x16x8xf32>
    tpu.vector_store %arg21[%c1_58, %c0_59, %c8_60], %140 {strides = array<i32>} : memref<2x16x16xf32, #tpu.memory_space<vmem>>, vector<1x16x8xf32>,
    %c0_61 = arith.constant 0 : index
    %c0_62 = arith.constant 0 : index
    %141 = vector.load %arg8[%c0_61, %c0_62] : memref<16x16xf32, #tpu.memory_space<vmem>>, vector<16x16xf32>
    %c0_63 = arith.constant 0 : index
    %c0_64 = arith.constant 0 : index
    %142 = vector.load %arg9[%c0_63, %c0_64] : memref<1x16xf32, #tpu.memory_space<vmem>>, vector<1x16xf32>
    %c0_65 = arith.constant 0 : index
    %c0_66 = arith.constant 0 : index
    %143 = vector.load %arg10[%c0_65, %c0_66] : memref<16x1xf32, #tpu.memory_space<vmem>>, vector<16x1xf32>
    %c0_67 = arith.constant 0 : index
    %c0_68 = arith.constant 0 : index
    %c0_69 = arith.constant 0 : index
    %144 = vector.load %arg21[%c0_67, %c0_68, %c0_69] : memref<2x16x16xf32, #tpu.memory_space<vmem>>, vector<1x16x16xf32>
    %145 = vector.shape_cast %144 : vector<1x16x16xf32> to vector<16x16xf32>
    %cst_70 = arith.constant dense<0.000000e+00> : vector<16x16xf32>
    %146 = tpu.matmul %145, %141, %cst_70 {dimension_numbers = #tpu.dot_dimension_numbers<[1], [0], [0], [1], [0, 0, 1, 1], [], []>} : vector<16x16xf32>, vector<16x16xf32>, vector<16x16xf32> -> vector<16x16xf32>
    %147 = vector.broadcast %142 : vector<1x16xf32> to vector<16x16xf32>
    %148 = arith.addf %146, %147 : vector<16x16xf32>
    %149 = math.tanh %148 : vector<16x16xf32>
    %cst_71 = arith.constant dense<0.000000e+00> : vector<16x1xf32>
    %150 = tpu.matmul %149, %143, %cst_71 {dimension_numbers = #tpu.dot_dimension_numbers<[1], [0], [0], [1], [0, 0, 1, 1], [], []>} : vector<16x16xf32>, vector<16x1xf32>, vector<16x1xf32> -> vector<16x1xf32>
    %151 = vector.shape_cast %150 : vector<16x1xf32> to vector<1x16x1xf32>
    %cst_72 = arith.constant dense<0.000000e+00> : vector<1xf32>
    %152 = vector.multi_reduction <add>, %151, %cst_72 [1, 2] : vector<1x16x1xf32> to vector<1xf32>
    %153 = vector.shape_cast %152 : vector<1xf32> to vector<1x1x1xf32>
    %154 = vector.extract %153[0, 0, 0] : f32 from vector<1x1x1xf32>
    %155 = vector.broadcast %154 : f32 to vector<1x1xf32>
    %cst_73 = arith.constant 1.600000e+01 : f32
    %156 = vector.broadcast %cst_73 : f32 to vector<1x1xf32>
    %157 = arith.divf %155, %156 : vector<1x1xf32>
    %c1_74 = arith.constant 1 : index
    %c0_75 = arith.constant 0 : index
    %c0_76 = arith.constant 0 : index
    %158 = vector.load %arg21[%c1_74, %c0_75, %c0_76] : memref<2x16x16xf32, #tpu.memory_space<vmem>>, vector<1x16x16xf32>
    %159 = vector.shape_cast %158 : vector<1x16x16xf32> to vector<16x16xf32>
    %cst_77 = arith.constant dense<0.000000e+00> : vector<16x16xf32>
    %160 = tpu.matmul %159, %141, %cst_77 {dimension_numbers = #tpu.dot_dimension_numbers<[1], [0], [0], [1], [0, 0, 1, 1], [], []>} : vector<16x16xf32>, vector<16x16xf32>, vector<16x16xf32> -> vector<16x16xf32>
    %161 = vector.broadcast %142 : vector<1x16xf32> to vector<16x16xf32>
    %162 = arith.addf %160, %161 : vector<16x16xf32>
    %163 = math.tanh %162 : vector<16x16xf32>
    %cst_78 = arith.constant dense<0.000000e+00> : vector<16x1xf32>
    %164 = tpu.matmul %163, %143, %cst_78 {dimension_numbers = #tpu.dot_dimension_numbers<[1], [0], [0], [1], [0, 0, 1, 1], [], []>} : vector<16x16xf32>, vector<16x1xf32>, vector<16x1xf32> -> vector<16x1xf32>
    %165 = vector.shape_cast %164 : vector<16x1xf32> to vector<1x16x1xf32>
    %cst_79 = arith.constant dense<0.000000e+00> : vector<1xf32>
    %166 = vector.multi_reduction <add>, %165, %cst_79 [1, 2] : vector<1x16x1xf32> to vector<1xf32>
    %167 = vector.shape_cast %166 : vector<1xf32> to vector<1x1x1xf32>
    %168 = vector.extract %167[0, 0, 0] : f32 from vector<1x1x1xf32>
    %169 = vector.broadcast %168 : f32 to vector<1x1xf32>
    %cst_80 = arith.constant 1.600000e+01 : f32
    %170 = vector.broadcast %cst_80 : f32 to vector<1x1xf32>
    %171 = arith.divf %169, %170 : vector<1x1xf32>
    %172 = arith.maximumf %157, %171 : vector<1x1xf32>
    %173 = arith.subf %157, %172 : vector<1x1xf32>
    %174 = math.exp %173 : vector<1x1xf32>
    %175 = arith.subf %171, %172 : vector<1x1xf32>
    %176 = math.exp %175 : vector<1x1xf32>
    %177 = arith.addf %174, %176 : vector<1x1xf32>
    %178 = arith.divf %174, %177 : vector<1x1xf32>
    %c0_81 = arith.constant 0 : index
    %c0_82 = arith.constant 0 : index
    %c0_83 = arith.constant 0 : index
    %179 = vector.load %arg21[%c0_81, %c0_82, %c0_83] : memref<2x16x16xf32, #tpu.memory_space<vmem>>, vector<1x16x16xf32>
    %180 = vector.shape_cast %179 : vector<1x16x16xf32> to vector<16x16xf32>
    %181 = vector.broadcast %178 : vector<1x1xf32> to vector<16x16xf32>
    %182 = arith.mulf %181, %180 : vector<16x16xf32>
    %183 = arith.divf %176, %177 : vector<1x1xf32>
    %c1_84 = arith.constant 1 : index
    %c0_85 = arith.constant 0 : index
    %c0_86 = arith.constant 0 : index
    %184 = vector.load %arg21[%c1_84, %c0_85, %c0_86] : memref<2x16x16xf32, #tpu.memory_space<vmem>>, vector<1x16x16xf32>
    %185 = vector.shape_cast %184 : vector<1x16x16xf32> to vector<16x16xf32>
    %186 = vector.broadcast %183 : vector<1x1xf32> to vector<16x16xf32>
    %187 = arith.mulf %186, %185 : vector<16x16xf32>
    %188 = arith.addf %182, %187 : vector<16x16xf32>
    %c0_87 = arith.constant 0 : index
    %c0_88 = arith.constant 0 : index
    %189 = vector.load %arg17[%c0_87, %c0_88] : memref<24x16xf32, #tpu.memory_space<vmem>>, vector<24x16xf32>
    %cst_89 = arith.constant dense<0.000000e+00> : vector<16x16xf32>
    %190 = tpu.matmul %6, %189, %cst_89 {dimension_numbers = #tpu.dot_dimension_numbers<[1], [0], [0], [1], [0, 0, 1, 1], [], []>} : vector<16x24xf32>, vector<24x16xf32>, vector<16x16xf32> -> vector<16x16xf32>
    %191 = arith.addf %188, %190 : vector<16x16xf32>
    %cst_90 = arith.constant 0.000000e+00 : f32
    %192 = vector.broadcast %cst_90 : f32 to vector<16x16xf32>
    %193 = arith.cmpf ogt, %191, %192 : vector<16x16xf32>
    %cst_91 = arith.constant 0.000000e+00 : f32
    %194 = vector.broadcast %cst_91 : f32 to vector<16x16xf32>
    %195 = arith.minimumf %191, %194 : vector<16x16xf32>
    %196 = math.exp %195 : vector<16x16xf32>
    %cst_92 = arith.constant 1.000000e+00 : f32
    %197 = vector.broadcast %cst_92 : f32 to vector<16x16xf32>
    %198 = arith.subf %196, %197 : vector<16x16xf32>
    %199 = arith.select %193, %191, %198 : vector<16x16xi1>, vector<16x16xf32>
    %c0_93 = arith.constant 0 : index
    %c0_94 = arith.constant 0 : index
    %200 = vector.load %arg11[%c0_93, %c0_94] : memref<16x32xf32, #tpu.memory_space<vmem>>, vector<16x32xf32>
    %cst_95 = arith.constant dense<0.000000e+00> : vector<16x32xf32>
    %201 = tpu.matmul %199, %200, %cst_95 {dimension_numbers = #tpu.dot_dimension_numbers<[1], [0], [0], [1], [0, 0, 1, 1], [], []>} : vector<16x16xf32>, vector<16x32xf32>, vector<16x32xf32> -> vector<16x32xf32>
    %c0_96 = arith.constant 0 : index
    %c0_97 = arith.constant 0 : index
    %202 = vector.load %arg13[%c0_96, %c0_97] : memref<32x4xf32, #tpu.memory_space<vmem>>, vector<32x4xf32>
    %cst_98 = arith.constant dense<0.000000e+00> : vector<16x4xf32>
    %203 = tpu.matmul %201, %202, %cst_98 {dimension_numbers = #tpu.dot_dimension_numbers<[1], [0], [0], [1], [0, 0, 1, 1], [], []>} : vector<16x32xf32>, vector<32x4xf32>, vector<16x4xf32> -> vector<16x4xf32>
    %c0_99 = arith.constant 0 : index
    %c0_100 = arith.constant 0 : index
    %204 = vector.load %arg12[%c0_99, %c0_100] : memref<4x32xf32, #tpu.memory_space<vmem>>, vector<4x32xf32>
    %cst_101 = arith.constant dense<0.000000e+00> : vector<4x16xf32>
    %205 = tpu.matmul %204, %201, %cst_101 {dimension_numbers = #tpu.dot_dimension_numbers<[1], [1], [0], [0], [0, 0, 1, 0], [], []>} : vector<4x32xf32>, vector<16x32xf32>, vector<4x16xf32> -> vector<4x16xf32>
    %206 = vector.extract_strided_slice %0 {offsets = [0, 0, 0], sizes = [1, 16, 16], strides = [1, 1, 1]} : vector<2x16x16xf32> to vector<1x16x16xf32>
    %207 = vector.shape_cast %206 : vector<1x16x16xf32> to vector<16x16xf32>
    %cst_102 = arith.constant 0.000000e+00 : f32
    %208 = vector.broadcast %cst_102 : f32 to vector<16x16xf32>
    %209 = arith.cmpf ogt, %207, %208 : vector<16x16xf32>
    %210 = vector.extract_strided_slice %201 {offsets = [0, 0], sizes = [16, 8], strides = [1, 1]} : vector<16x32xf32> to vector<16x8xf32>
    %211 = vector.extract_strided_slice %203 {offsets = [0, 0], sizes = [16, 1], strides = [1, 1]} : vector<16x4xf32> to vector<16x1xf32>
    %212 = vector.extract_strided_slice %205 {offsets = [0, 0], sizes = [1, 16], strides = [1, 1]} : vector<4x16xf32> to vector<1x16xf32>
    %213 = vector.broadcast %211 : vector<16x1xf32> to vector<16x16xf32>
    %214 = vector.broadcast %212 : vector<1x16xf32> to vector<16x16xf32>
    %215 = arith.addf %213, %214 : vector<16x16xf32>
    %cst_103 = arith.constant 0.000000e+00 : f32
    %216 = vector.broadcast %cst_103 : f32 to vector<16x16xf32>
    %217 = arith.cmpf ogt, %215, %216 : vector<16x16xf32>
    %cst_104 = arith.constant 2.000000e-01 : f32
    %218 = vector.broadcast %cst_104 : f32 to vector<16x16xf32>
    %219 = arith.mulf %218, %215 : vector<16x16xf32>
    %220 = arith.select %217, %215, %219 : vector<16x16xi1>, vector<16x16xf32>
    %cst_105 = arith.constant -1.000000e+30 : f32
    %221 = vector.broadcast %cst_105 : f32 to vector<16x16xf32>
    %222 = arith.select %209, %220, %221 : vector<16x16xi1>, vector<16x16xf32>
    %cst_106 = arith.constant dense<0xFF800000> : vector<16xf32>
    %223 = vector.multi_reduction <maximumf>, %222, %cst_106 [1] : vector<16x16xf32> to vector<16xf32>
    %224 = vector.shape_cast %223 : vector<16xf32> to vector<16x1xf32>
    %225 = vector.broadcast %224 : vector<16x1xf32> to vector<16x16xf32>
    %226 = arith.subf %222, %225 : vector<16x16xf32>
    %227 = math.exp %226 : vector<16x16xf32>
    %cst_107 = arith.constant 0.000000e+00 : f32
    %228 = vector.broadcast %cst_107 : f32 to vector<16x16xf32>
    %229 = arith.select %209, %227, %228 : vector<16x16xi1>, vector<16x16xf32>
    %cst_108 = arith.constant dense<0.000000e+00> : vector<16xf32>
    %230 = vector.multi_reduction <add>, %229, %cst_108 [1] : vector<16x16xf32> to vector<16xf32>
    %231 = vector.shape_cast %230 : vector<16xf32> to vector<16x1xf32>
    %cst_109 = arith.constant 1.000000e-30 : f32
    %232 = vector.broadcast %cst_109 : f32 to vector<16x1xf32>
    %233 = arith.maximumf %231, %232 : vector<16x1xf32>
    %234 = vector.broadcast %233 : vector<16x1xf32> to vector<16x16xf32>
    %235 = arith.divf %229, %234 : vector<16x16xf32>
    %cst_110 = arith.constant dense<0.000000e+00> : vector<16x8xf32>
    %236 = tpu.matmul %235, %210, %cst_110 {dimension_numbers = #tpu.dot_dimension_numbers<[1], [0], [0], [1], [0, 0, 1, 1], [], []>} : vector<16x16xf32>, vector<16x8xf32>, vector<16x8xf32> -> vector<16x8xf32>
    %c0_111 = arith.constant 0 : index
    %c0_112 = arith.constant 0 : index
    %c0_113 = arith.constant 0 : index
    %237 = vector.load %arg21[%c0_111, %c0_112, %c0_113] : memref<2x16x16xf32, #tpu.memory_space<vmem>>, vector<1x16x8xf32>
    %238 = vector.shape_cast %237 : vector<1x16x8xf32> to vector<16x8xf32>
    %239 = vector.shape_cast %236 : vector<16x8xf32> to vector<1x16x8xf32>
    tpu.vector_store %arg21[%c0_111, %c0_112, %c0_113], %239 {strides = array<i32>} : memref<2x16x16xf32, #tpu.memory_space<vmem>>, vector<1x16x8xf32>,
    %240 = vector.extract_strided_slice %201 {offsets = [0, 8], sizes = [16, 8], strides = [1, 1]} : vector<16x32xf32> to vector<16x8xf32>
    %241 = vector.extract_strided_slice %203 {offsets = [0, 1], sizes = [16, 1], strides = [1, 1]} : vector<16x4xf32> to vector<16x1xf32>
    %242 = vector.extract_strided_slice %205 {offsets = [1, 0], sizes = [1, 16], strides = [1, 1]} : vector<4x16xf32> to vector<1x16xf32>
    %243 = vector.broadcast %241 : vector<16x1xf32> to vector<16x16xf32>
    %244 = vector.broadcast %242 : vector<1x16xf32> to vector<16x16xf32>
    %245 = arith.addf %243, %244 : vector<16x16xf32>
    %cst_114 = arith.constant 0.000000e+00 : f32
    %246 = vector.broadcast %cst_114 : f32 to vector<16x16xf32>
    %247 = arith.cmpf ogt, %245, %246 : vector<16x16xf32>
    %cst_115 = arith.constant 2.000000e-01 : f32
    %248 = vector.broadcast %cst_115 : f32 to vector<16x16xf32>
    %249 = arith.mulf %248, %245 : vector<16x16xf32>
    %250 = arith.select %247, %245, %249 : vector<16x16xi1>, vector<16x16xf32>
    %cst_116 = arith.constant -1.000000e+30 : f32
    %251 = vector.broadcast %cst_116 : f32 to vector<16x16xf32>
    %252 = arith.select %209, %250, %251 : vector<16x16xi1>, vector<16x16xf32>
    %cst_117 = arith.constant dense<0xFF800000> : vector<16xf32>
    %253 = vector.multi_reduction <maximumf>, %252, %cst_117 [1] : vector<16x16xf32> to vector<16xf32>
    %254 = vector.shape_cast %253 : vector<16xf32> to vector<16x1xf32>
    %255 = vector.broadcast %254 : vector<16x1xf32> to vector<16x16xf32>
    %256 = arith.subf %252, %255 : vector<16x16xf32>
    %257 = math.exp %256 : vector<16x16xf32>
    %cst_118 = arith.constant 0.000000e+00 : f32
    %258 = vector.broadcast %cst_118 : f32 to vector<16x16xf32>
    %259 = arith.select %209, %257, %258 : vector<16x16xi1>, vector<16x16xf32>
    %cst_119 = arith.constant dense<0.000000e+00> : vector<16xf32>
    %260 = vector.multi_reduction <add>, %259, %cst_119 [1] : vector<16x16xf32> to vector<16xf32>
    %261 = vector.shape_cast %260 : vector<16xf32> to vector<16x1xf32>
    %cst_120 = arith.constant 1.000000e-30 : f32
    %262 = vector.broadcast %cst_120 : f32 to vector<16x1xf32>
    %263 = arith.maximumf %261, %262 : vector<16x1xf32>
    %264 = vector.broadcast %263 : vector<16x1xf32> to vector<16x16xf32>
    %265 = arith.divf %259, %264 : vector<16x16xf32>
    %cst_121 = arith.constant dense<0.000000e+00> : vector<16x8xf32>
    %266 = tpu.matmul %265, %240, %cst_121 {dimension_numbers = #tpu.dot_dimension_numbers<[1], [0], [0], [1], [0, 0, 1, 1], [], []>} : vector<16x16xf32>, vector<16x8xf32>, vector<16x8xf32> -> vector<16x8xf32>
    %c0_122 = arith.constant 0 : index
    %c0_123 = arith.constant 0 : index
    %c8_124 = arith.constant 8 : index
    %267 = vector.load %arg21[%c0_122, %c0_123, %c8_124] : memref<2x16x16xf32, #tpu.memory_space<vmem>>, vector<1x16x8xf32>
    %268 = vector.shape_cast %267 : vector<1x16x8xf32> to vector<16x8xf32>
    %269 = vector.shape_cast %266 : vector<16x8xf32> to vector<1x16x8xf32>
    tpu.vector_store %arg21[%c0_122, %c0_123, %c8_124], %269 {strides = array<i32>} : memref<2x16x16xf32, #tpu.memory_space<vmem>>, vector<1x16x8xf32>,
    %270 = vector.extract_strided_slice %0 {offsets = [1, 0, 0], sizes = [1, 16, 16], strides = [1, 1, 1]} : vector<2x16x16xf32> to vector<1x16x16xf32>
    %271 = vector.shape_cast %270 : vector<1x16x16xf32> to vector<16x16xf32>
    %cst_125 = arith.constant 0.000000e+00 : f32
    %272 = vector.broadcast %cst_125 : f32 to vector<16x16xf32>
    %273 = arith.cmpf ogt, %271, %272 : vector<16x16xf32>
    %274 = vector.extract_strided_slice %201 {offsets = [0, 16], sizes = [16, 8], strides = [1, 1]} : vector<16x32xf32> to vector<16x8xf32>
    %275 = vector.extract_strided_slice %203 {offsets = [0, 2], sizes = [16, 1], strides = [1, 1]} : vector<16x4xf32> to vector<16x1xf32>
    %276 = vector.extract_strided_slice %205 {offsets = [2, 0], sizes = [1, 16], strides = [1, 1]} : vector<4x16xf32> to vector<1x16xf32>
    %277 = vector.broadcast %275 : vector<16x1xf32> to vector<16x16xf32>
    %278 = vector.broadcast %276 : vector<1x16xf32> to vector<16x16xf32>
    %279 = arith.addf %277, %278 : vector<16x16xf32>
    %cst_126 = arith.constant 0.000000e+00 : f32
    %280 = vector.broadcast %cst_126 : f32 to vector<16x16xf32>
    %281 = arith.cmpf ogt, %279, %280 : vector<16x16xf32>
    %cst_127 = arith.constant 2.000000e-01 : f32
    %282 = vector.broadcast %cst_127 : f32 to vector<16x16xf32>
    %283 = arith.mulf %282, %279 : vector<16x16xf32>
    %284 = arith.select %281, %279, %283 : vector<16x16xi1>, vector<16x16xf32>
    %cst_128 = arith.constant -1.000000e+30 : f32
    %285 = vector.broadcast %cst_128 : f32 to vector<16x16xf32>
    %286 = arith.select %273, %284, %285 : vector<16x16xi1>, vector<16x16xf32>
    %cst_129 = arith.constant dense<0xFF800000> : vector<16xf32>
    %287 = vector.multi_reduction <maximumf>, %286, %cst_129 [1] : vector<16x16xf32> to vector<16xf32>
    %288 = vector.shape_cast %287 : vector<16xf32> to vector<16x1xf32>
    %289 = vector.broadcast %288 : vector<16x1xf32> to vector<16x16xf32>
    %290 = arith.subf %286, %289 : vector<16x16xf32>
    %291 = math.exp %290 : vector<16x16xf32>
    %cst_130 = arith.constant 0.000000e+00 : f32
    %292 = vector.broadcast %cst_130 : f32 to vector<16x16xf32>
    %293 = arith.select %273, %291, %292 : vector<16x16xi1>, vector<16x16xf32>
    %cst_131 = arith.constant dense<0.000000e+00> : vector<16xf32>
    %294 = vector.multi_reduction <add>, %293, %cst_131 [1] : vector<16x16xf32> to vector<16xf32>
    %295 = vector.shape_cast %294 : vector<16xf32> to vector<16x1xf32>
    %cst_132 = arith.constant 1.000000e-30 : f32
    %296 = vector.broadcast %cst_132 : f32 to vector<16x1xf32>
    %297 = arith.maximumf %295, %296 : vector<16x1xf32>
    %298 = vector.broadcast %297 : vector<16x1xf32> to vector<16x16xf32>
    %299 = arith.divf %293, %298 : vector<16x16xf32>
    %cst_133 = arith.constant dense<0.000000e+00> : vector<16x8xf32>
    %300 = tpu.matmul %299, %274, %cst_133 {dimension_numbers = #tpu.dot_dimension_numbers<[1], [0], [0], [1], [0, 0, 1, 1], [], []>} : vector<16x16xf32>, vector<16x8xf32>, vector<16x8xf32> -> vector<16x8xf32>
    %c1_134 = arith.constant 1 : index
    %c0_135 = arith.constant 0 : index
    %c0_136 = arith.constant 0 : index
    %301 = vector.load %arg21[%c1_134, %c0_135, %c0_136] : memref<2x16x16xf32, #tpu.memory_space<vmem>>, vector<1x16x8xf32>
    %302 = vector.shape_cast %301 : vector<1x16x8xf32> to vector<16x8xf32>
    %303 = vector.shape_cast %300 : vector<16x8xf32> to vector<1x16x8xf32>
    tpu.vector_store %arg21[%c1_134, %c0_135, %c0_136], %303 {strides = array<i32>} : memref<2x16x16xf32, #tpu.memory_space<vmem>>, vector<1x16x8xf32>,
    %304 = vector.extract_strided_slice %201 {offsets = [0, 24], sizes = [16, 8], strides = [1, 1]} : vector<16x32xf32> to vector<16x8xf32>
    %305 = vector.extract_strided_slice %203 {offsets = [0, 3], sizes = [16, 1], strides = [1, 1]} : vector<16x4xf32> to vector<16x1xf32>
    %306 = vector.extract_strided_slice %205 {offsets = [3, 0], sizes = [1, 16], strides = [1, 1]} : vector<4x16xf32> to vector<1x16xf32>
    %307 = vector.broadcast %305 : vector<16x1xf32> to vector<16x16xf32>
    %308 = vector.broadcast %306 : vector<1x16xf32> to vector<16x16xf32>
    %309 = arith.addf %307, %308 : vector<16x16xf32>
    %cst_137 = arith.constant 0.000000e+00 : f32
    %310 = vector.broadcast %cst_137 : f32 to vector<16x16xf32>
    %311 = arith.cmpf ogt, %309, %310 : vector<16x16xf32>
    %cst_138 = arith.constant 2.000000e-01 : f32
    %312 = vector.broadcast %cst_138 : f32 to vector<16x16xf32>
    %313 = arith.mulf %312, %309 : vector<16x16xf32>
    %314 = arith.select %311, %309, %313 : vector<16x16xi1>, vector<16x16xf32>
    %cst_139 = arith.constant -1.000000e+30 : f32
    %315 = vector.broadcast %cst_139 : f32 to vector<16x16xf32>
    %316 = arith.select %273, %314, %315 : vector<16x16xi1>, vector<16x16xf32>
    %cst_140 = arith.constant dense<0xFF800000> : vector<16xf32>
    %317 = vector.multi_reduction <maximumf>, %316, %cst_140 [1] : vector<16x16xf32> to vector<16xf32>
    %318 = vector.shape_cast %317 : vector<16xf32> to vector<16x1xf32>
    %319 = vector.broadcast %318 : vector<16x1xf32> to vector<16x16xf32>
    %320 = arith.subf %316, %319 : vector<16x16xf32>
    %321 = math.exp %320 : vector<16x16xf32>
    %cst_141 = arith.constant 0.000000e+00 : f32
    %322 = vector.broadcast %cst_141 : f32 to vector<16x16xf32>
    %323 = arith.select %273, %321, %322 : vector<16x16xi1>, vector<16x16xf32>
    %cst_142 = arith.constant dense<0.000000e+00> : vector<16xf32>
    %324 = vector.multi_reduction <add>, %323, %cst_142 [1] : vector<16x16xf32> to vector<16xf32>
    %325 = vector.shape_cast %324 : vector<16xf32> to vector<16x1xf32>
    %cst_143 = arith.constant 1.000000e-30 : f32
    %326 = vector.broadcast %cst_143 : f32 to vector<16x1xf32>
    %327 = arith.maximumf %325, %326 : vector<16x1xf32>
    %328 = vector.broadcast %327 : vector<16x1xf32> to vector<16x16xf32>
    %329 = arith.divf %323, %328 : vector<16x16xf32>
    %cst_144 = arith.constant dense<0.000000e+00> : vector<16x8xf32>
    %330 = tpu.matmul %329, %304, %cst_144 {dimension_numbers = #tpu.dot_dimension_numbers<[1], [0], [0], [1], [0, 0, 1, 1], [], []>} : vector<16x16xf32>, vector<16x8xf32>, vector<16x8xf32> -> vector<16x8xf32>
    %c1_145 = arith.constant 1 : index
    %c0_146 = arith.constant 0 : index
    %c8_147 = arith.constant 8 : index
    %331 = vector.load %arg21[%c1_145, %c0_146, %c8_147] : memref<2x16x16xf32, #tpu.memory_space<vmem>>, vector<1x16x8xf32>
    %332 = vector.shape_cast %331 : vector<1x16x8xf32> to vector<16x8xf32>
    %333 = vector.shape_cast %330 : vector<16x8xf32> to vector<1x16x8xf32>
    tpu.vector_store %arg21[%c1_145, %c0_146, %c8_147], %333 {strides = array<i32>} : memref<2x16x16xf32, #tpu.memory_space<vmem>>, vector<1x16x8xf32>,
    %c0_148 = arith.constant 0 : index
    %c0_149 = arith.constant 0 : index
    %334 = vector.load %arg14[%c0_148, %c0_149] : memref<16x16xf32, #tpu.memory_space<vmem>>, vector<16x16xf32>
    %c0_150 = arith.constant 0 : index
    %c0_151 = arith.constant 0 : index
    %335 = vector.load %arg15[%c0_150, %c0_151] : memref<1x16xf32, #tpu.memory_space<vmem>>, vector<1x16xf32>
    %c0_152 = arith.constant 0 : index
    %c0_153 = arith.constant 0 : index
    %336 = vector.load %arg16[%c0_152, %c0_153] : memref<16x1xf32, #tpu.memory_space<vmem>>, vector<16x1xf32>
    %c0_154 = arith.constant 0 : index
    %c0_155 = arith.constant 0 : index
    %c0_156 = arith.constant 0 : index
    %337 = vector.load %arg21[%c0_154, %c0_155, %c0_156] : memref<2x16x16xf32, #tpu.memory_space<vmem>>, vector<1x16x16xf32>
    %338 = vector.shape_cast %337 : vector<1x16x16xf32> to vector<16x16xf32>
    %cst_157 = arith.constant dense<0.000000e+00> : vector<16x16xf32>
    %339 = tpu.matmul %338, %334, %cst_157 {dimension_numbers = #tpu.dot_dimension_numbers<[1], [0], [0], [1], [0, 0, 1, 1], [], []>} : vector<16x16xf32>, vector<16x16xf32>, vector<16x16xf32> -> vector<16x16xf32>
    %340 = vector.broadcast %335 : vector<1x16xf32> to vector<16x16xf32>
    %341 = arith.addf %339, %340 : vector<16x16xf32>
    %342 = math.tanh %341 : vector<16x16xf32>
    %cst_158 = arith.constant dense<0.000000e+00> : vector<16x1xf32>
    %343 = tpu.matmul %342, %336, %cst_158 {dimension_numbers = #tpu.dot_dimension_numbers<[1], [0], [0], [1], [0, 0, 1, 1], [], []>} : vector<16x16xf32>, vector<16x1xf32>, vector<16x1xf32> -> vector<16x1xf32>
    %344 = vector.shape_cast %343 : vector<16x1xf32> to vector<1x16x1xf32>
    %cst_159 = arith.constant dense<0.000000e+00> : vector<1xf32>
    %345 = vector.multi_reduction <add>, %344, %cst_159 [1, 2] : vector<1x16x1xf32> to vector<1xf32>
    %346 = vector.shape_cast %345 : vector<1xf32> to vector<1x1x1xf32>
    %347 = vector.extract %346[0, 0, 0] : f32 from vector<1x1x1xf32>
    %348 = vector.broadcast %347 : f32 to vector<1x1xf32>
    %cst_160 = arith.constant 1.600000e+01 : f32
    %349 = vector.broadcast %cst_160 : f32 to vector<1x1xf32>
    %350 = arith.divf %348, %349 : vector<1x1xf32>
    %c1_161 = arith.constant 1 : index
    %c0_162 = arith.constant 0 : index
    %c0_163 = arith.constant 0 : index
    %351 = vector.load %arg21[%c1_161, %c0_162, %c0_163] : memref<2x16x16xf32, #tpu.memory_space<vmem>>, vector<1x16x16xf32>
    %352 = vector.shape_cast %351 : vector<1x16x16xf32> to vector<16x16xf32>
    %cst_164 = arith.constant dense<0.000000e+00> : vector<16x16xf32>
    %353 = tpu.matmul %352, %334, %cst_164 {dimension_numbers = #tpu.dot_dimension_numbers<[1], [0], [0], [1], [0, 0, 1, 1], [], []>} : vector<16x16xf32>, vector<16x16xf32>, vector<16x16xf32> -> vector<16x16xf32>
    %354 = vector.broadcast %335 : vector<1x16xf32> to vector<16x16xf32>
    %355 = arith.addf %353, %354 : vector<16x16xf32>
    %356 = math.tanh %355 : vector<16x16xf32>
    %cst_165 = arith.constant dense<0.000000e+00> : vector<16x1xf32>
    %357 = tpu.matmul %356, %336, %cst_165 {dimension_numbers = #tpu.dot_dimension_numbers<[1], [0], [0], [1], [0, 0, 1, 1], [], []>} : vector<16x16xf32>, vector<16x1xf32>, vector<16x1xf32> -> vector<16x1xf32>
    %358 = vector.shape_cast %357 : vector<16x1xf32> to vector<1x16x1xf32>
    %cst_166 = arith.constant dense<0.000000e+00> : vector<1xf32>
    %359 = vector.multi_reduction <add>, %358, %cst_166 [1, 2] : vector<1x16x1xf32> to vector<1xf32>
    %360 = vector.shape_cast %359 : vector<1xf32> to vector<1x1x1xf32>
    %361 = vector.extract %360[0, 0, 0] : f32 from vector<1x1x1xf32>
    %362 = vector.broadcast %361 : f32 to vector<1x1xf32>
    %cst_167 = arith.constant 1.600000e+01 : f32
    %363 = vector.broadcast %cst_167 : f32 to vector<1x1xf32>
    %364 = arith.divf %362, %363 : vector<1x1xf32>
    %365 = arith.maximumf %350, %364 : vector<1x1xf32>
    %366 = arith.subf %350, %365 : vector<1x1xf32>
    %367 = math.exp %366 : vector<1x1xf32>
    %368 = arith.subf %364, %365 : vector<1x1xf32>
    %369 = math.exp %368 : vector<1x1xf32>
    %370 = arith.addf %367, %369 : vector<1x1xf32>
    %371 = arith.divf %367, %370 : vector<1x1xf32>
    %c0_168 = arith.constant 0 : index
    %c0_169 = arith.constant 0 : index
    %c0_170 = arith.constant 0 : index
    %372 = vector.load %arg21[%c0_168, %c0_169, %c0_170] : memref<2x16x16xf32, #tpu.memory_space<vmem>>, vector<1x16x16xf32>
    %373 = vector.shape_cast %372 : vector<1x16x16xf32> to vector<16x16xf32>
    %374 = vector.broadcast %371 : vector<1x1xf32> to vector<16x16xf32>
    %375 = arith.mulf %374, %373 : vector<16x16xf32>
    %376 = arith.divf %369, %370 : vector<1x1xf32>
    %c1_171 = arith.constant 1 : index
    %c0_172 = arith.constant 0 : index
    %c0_173 = arith.constant 0 : index
    %377 = vector.load %arg21[%c1_171, %c0_172, %c0_173] : memref<2x16x16xf32, #tpu.memory_space<vmem>>, vector<1x16x16xf32>
    %378 = vector.shape_cast %377 : vector<1x16x16xf32> to vector<16x16xf32>
    %379 = vector.broadcast %376 : vector<1x1xf32> to vector<16x16xf32>
    %380 = arith.mulf %379, %378 : vector<16x16xf32>
    %381 = arith.addf %375, %380 : vector<16x16xf32>
    %382 = arith.addf %381, %199 : vector<16x16xf32>
    %cst_174 = arith.constant 0.000000e+00 : f32
    %383 = vector.broadcast %cst_174 : f32 to vector<16x16xf32>
    %384 = arith.cmpf ogt, %382, %383 : vector<16x16xf32>
    %cst_175 = arith.constant 0.000000e+00 : f32
    %385 = vector.broadcast %cst_175 : f32 to vector<16x16xf32>
    %386 = arith.minimumf %382, %385 : vector<16x16xf32>
    %387 = math.exp %386 : vector<16x16xf32>
    %cst_176 = arith.constant 1.000000e+00 : f32
    %388 = vector.broadcast %cst_176 : f32 to vector<16x16xf32>
    %389 = arith.subf %387, %388 : vector<16x16xf32>
    %390 = arith.select %384, %382, %389 : vector<16x16xi1>, vector<16x16xf32>
    %c0_177 = arith.constant 0 : index
    %c0_178 = arith.constant 0 : index
    %391 = vector.load %arg18[%c0_177, %c0_178] : memref<16x4xf32, #tpu.memory_space<vmem>>, vector<16x4xf32>
    %cst_179 = arith.constant dense<0.000000e+00> : vector<16x4xf32>
    %392 = tpu.matmul %390, %391, %cst_179 {dimension_numbers = #tpu.dot_dimension_numbers<[1], [0], [0], [1], [0, 0, 1, 1], [], []>} : vector<16x16xf32>, vector<16x4xf32>, vector<16x4xf32> -> vector<16x4xf32>
    %c0_180 = arith.constant 0 : index
    %c0_181 = arith.constant 0 : index
    %393 = vector.load %arg19[%c0_180, %c0_181] : memref<1x4xf32, #tpu.memory_space<vmem>>, vector<1x4xf32>
    %394 = vector.broadcast %393 : vector<1x4xf32> to vector<16x4xf32>
    %395 = arith.addf %392, %394 : vector<16x4xf32>
    %cst_182 = arith.constant 0.000000e+00 : f32
    %396 = vector.broadcast %cst_182 : f32 to vector<16x4xf32>
    %397 = arith.subf %396, %395 : vector<16x4xf32>
    %398 = math.exp %397 : vector<16x4xf32>
    %cst_183 = arith.constant 1.000000e+00 : f32
    %399 = vector.broadcast %cst_183 : f32 to vector<16x4xf32>
    %400 = arith.addf %399, %398 : vector<16x4xf32>
    %cst_184 = arith.constant 1.000000e+00 : f32
    %401 = vector.broadcast %cst_184 : f32 to vector<16x4xf32>
    %402 = arith.divf %401, %400 : vector<16x4xf32>
    %c0_185 = arith.constant 0 : index
    %c0_186 = arith.constant 0 : index
    %403 = vector.load %arg20[%c0_185, %c0_186] : memref<16x4xf32, #tpu.memory_space<vmem>>, vector<16x4xf32>
    tpu.vector_store %arg20[%c0_185, %c0_186], %402 {strides = array<i32>} : memref<16x4xf32, #tpu.memory_space<vmem>>, vector<16x4xf32>,
    return
  }
  func.func @transform_0(%arg0: i32) -> (i32, i32) {
    %c0_i32 = arith.constant 0 : i32
    %c0_i32_0 = arith.constant 0 : i32
    %c0_i32_1 = arith.constant 0 : i32
    return %c0_i32, %c0_i32_0 : i32, i32
  }
  func.func @transform_1(%arg0: i32) -> (i32, i32, i32) {
    %c0_i32 = arith.constant 0 : i32
    %c0_i32_0 = arith.constant 0 : i32
    %c0_i32_1 = arith.constant 0 : i32
    %c0_i32_2 = arith.constant 0 : i32
    return %c0_i32, %c0_i32_0, %c0_i32_1 : i32, i32, i32
  }
  func.func @transform_2(%arg0: i32) -> (i32, i32) {
    %c0_i32 = arith.constant 0 : i32
    %c0_i32_0 = arith.constant 0 : i32
    %c0_i32_1 = arith.constant 0 : i32
    return %c0_i32, %c0_i32_0 : i32, i32
  }
  func.func @transform_3(%arg0: i32) -> (i32, i32) {
    %c0_i32 = arith.constant 0 : i32
    %c0_i32_0 = arith.constant 0 : i32
    %c0_i32_1 = arith.constant 0 : i32
    return %c0_i32, %c0_i32_0 : i32, i32
  }
  func.func @transform_4(%arg0: i32) -> (i32, i32) {
    %c0_i32 = arith.constant 0 : i32
    %c0_i32_0 = arith.constant 0 : i32
    %c0_i32_1 = arith.constant 0 : i32
    return %c0_i32, %c0_i32_0 : i32, i32
  }
  func.func @transform_5(%arg0: i32) -> (i32, i32) {
    %c0_i32 = arith.constant 0 : i32
    %c0_i32_0 = arith.constant 0 : i32
    %c0_i32_1 = arith.constant 0 : i32
    return %c0_i32, %c0_i32_0 : i32, i32
  }
  func.func @transform_6(%arg0: i32) -> (i32, i32) {
    %c0_i32 = arith.constant 0 : i32
    %c0_i32_0 = arith.constant 0 : i32
    %c0_i32_1 = arith.constant 0 : i32
    return %c0_i32, %c0_i32_0 : i32, i32
  }
  func.func @transform_7(%arg0: i32) -> (i32, i32) {
    %c0_i32 = arith.constant 0 : i32
    %c0_i32_0 = arith.constant 0 : i32
    %c0_i32_1 = arith.constant 0 : i32
    return %c0_i32, %c0_i32_0 : i32, i32
  }
  func.func @transform_8(%arg0: i32) -> (i32, i32) {
    %c0_i32 = arith.constant 0 : i32
    %c0_i32_0 = arith.constant 0 : i32
    %c0_i32_1 = arith.constant 0 : i32
    return %c0_i32, %c0_i32_0 : i32, i32
  }
  func.func @transform_9(%arg0: i32) -> (i32, i32) {
    %c0_i32 = arith.constant 0 : i32
    %c0_i32_0 = arith.constant 0 : i32
    %c0_i32_1 = arith.constant 0 : i32
    return %c0_i32, %c0_i32_0 : i32, i32
  }
  func.func @transform_10(%arg0: i32) -> (i32, i32) {
    %c0_i32 = arith.constant 0 : i32
    %c0_i32_0 = arith.constant 0 : i32
    %c0_i32_1 = arith.constant 0 : i32
    return %c0_i32, %c0_i32_0 : i32, i32
  }
  func.func @transform_11(%arg0: i32) -> (i32, i32) {
    %c0_i32 = arith.constant 0 : i32
    %c0_i32_0 = arith.constant 0 : i32
    %c0_i32_1 = arith.constant 0 : i32
    return %c0_i32, %c0_i32_0 : i32, i32
  }
  func.func @transform_12(%arg0: i32) -> (i32, i32) {
    %c0_i32 = arith.constant 0 : i32
    %c0_i32_0 = arith.constant 0 : i32
    %c0_i32_1 = arith.constant 0 : i32
    return %c0_i32, %c0_i32_0 : i32, i32
  }
  func.func @transform_13(%arg0: i32) -> (i32, i32) {
    %c0_i32 = arith.constant 0 : i32
    %c0_i32_0 = arith.constant 0 : i32
    %c0_i32_1 = arith.constant 0 : i32
    return %c0_i32, %c0_i32_0 : i32, i32
  }
  func.func @transform_14(%arg0: i32) -> (i32, i32) {
    %c0_i32 = arith.constant 0 : i32
    %c0_i32_0 = arith.constant 0 : i32
    %c0_i32_1 = arith.constant 0 : i32
    return %c0_i32, %c0_i32_0 : i32, i32
  }
  func.func @transform_15(%arg0: i32) -> (i32, i32) {
    %c0_i32 = arith.constant 0 : i32
    %c0_i32_0 = arith.constant 0 : i32
    %c0_i32_1 = arith.constant 0 : i32
    return %c0_i32, %c0_i32_0 : i32, i32
  }
  func.func @transform_16(%arg0: i32) -> (i32, i32) {
    %c0_i32 = arith.constant 0 : i32
    %c0_i32_0 = arith.constant 0 : i32
    %c0_i32_1 = arith.constant 0 : i32
    return %c0_i32, %c0_i32_0 : i32, i32
  }
  func.func @transform_17(%arg0: i32) -> (i32, i32) {
    %c0_i32 = arith.constant 0 : i32
    %c0_i32_0 = arith.constant 0 : i32
    %c0_i32_1 = arith.constant 0 : i32
    return %c0_i32, %c0_i32_0 : i32, i32
  }
  func.func @transform_18(%arg0: i32) -> (i32, i32) {
    %c0_i32 = arith.constant 0 : i32
    %c0_i32_0 = arith.constant 0 : i32
    %c0_i32_1 = arith.constant 0 : i32
    return %c0_i32, %c0_i32_0 : i32, i32
  }
  func.func @transform_19(%arg0: i32) -> (i32, i32) {
    %c0_i32 = arith.constant 0 : i32
    %c0_i32_0 = arith.constant 0 : i32
    %c0_i32_1 = arith.constant 0 : i32
    return %c0_i32, %c0_i32_0 : i32, i32
  }
}

</mosaic_0001>

<bundles_post_ra>
// kernel: tpu_custom_call.1
= control target key start
LH: loop header
LB: loop body
LE: loop exit
PB: predicated region body
PF: predicated region fallthrough
CT: control target
= control target key end

     0   :  { %s2643_s0 = inlined_call_operand.vmem [shape: f32[16,12], index: 0, kind: input, shape index: {}]   ;;  %s2644_s1 = inlined_call_operand.vmem [shape: f32[2,16,16], index: 1, kind: input, shape index: {}]   ;;  %s2645_s2 = inlined_call_operand.vmem [shape: f32[12,24], index: 2, kind: input, shape index: {}]   ;;  %s2646_s3 = inlined_call_operand.vmem [shape: f32[1,24], index: 3, kind: input, shape index: {}]   ;;  %s2647_s4 = inlined_call_operand.vmem [shape: f32[24,32], index: 4, kind: input, shape index: {}]   ;;  %s2648_s5 = inlined_call_operand.hbm [shape: f32[4,32], index: 5, kind: input, shape index: {}]   ;;  %s2649_s6 = inlined_call_operand.vmem [shape: f32[32,4], index: 6, kind: input, shape index: {}]   ;;  %s2650_s7 = inlined_call_operand.vmem [shape: f32[16,16], index: 7, kind: input, shape index: {}]   ;;  %s2651_s8 = inlined_call_operand.vmem [shape: f32[1,16], index: 8, kind: input, shape index: {}]   ;;  %s2652_s9 = inlined_call_operand.vmem [shape: f32[16,1], index: 9, kind: input, shape index: {}]   ;;  %s2653_s10 = inlined_call_operand.vmem [shape: f32[16,32], index: 10, kind: input, shape index: {}]   ;;  %s2654_s11 = inlined_call_operand.vmem [shape: f32[4,32], index: 11, kind: input, shape index: {}]   ;;  %s2655_s12 = inlined_call_operand.vmem [shape: f32[32,4], index: 12, kind: input, shape index: {}]   ;;  %s2656_s13 = inlined_call_operand.vmem [shape: f32[16,16], index: 13, kind: input, shape index: {}]   ;;  %s2657_s14 = inlined_call_operand.vmem [shape: f32[1,16], index: 14, kind: input, shape index: {}]   ;;  %s2658_s15 = inlined_call_operand.vmem [shape: f32[16,1], index: 15, kind: input, shape index: {}]   ;;  %s2659_s16 = inlined_call_operand.vmem [shape: f32[24,16], index: 16, kind: input, shape index: {}]   ;;  %s2660_s17 = inlined_call_operand.vmem [shape: f32[16,4], index: 17, kind: input, shape index: {}]   ;;  %s2661_s18 = inlined_call_operand.vmem [shape: f32[1,4], index: 18, kind: input, shape index: {}]   ;;  %s2662_s19 = inlined_call_operand.vmem [shape: f32[16,4], index: 19, kind: output, shape index: {}]  }
   0x1   :  { %2666 = sst [smem:[#allocation6_spill]] %s2643_s0 }
   0x2   :  { %2667 = sst [smem:[#allocation7_spill]] %s2644_s1 }
   0x3   :  { %2668 = sst [smem:[#allocation8_spill]] %s2645_s2 }
   0x4   :  { %2669 = sst [smem:[#allocation9_spill]] %s2646_s3 }
   0x5   :  { %24 = vsyncpa [#allocation4], 0  ;;  %s40_s20 = sshll.u32 %s2648_s5, 4  ;;  %s1984_s21 = smov [#allocation3]   ;;  %s41_s20 = int_to_ptr.hbm [resolvable:$true] %s40_s20 }
   0x6   :  { %s42_s1 = sshll.u32 %s1984_s21, 4  ;;  %s43_s1 = int_to_ptr.vmem [resolvable:$true] %s42_s1 }
   0x7   :  { %45 = dma.hbm_to_vmem [thread:$0]  %s41_s20, 64, %s43_s1, [#allocation4]  }
   0x8   :  { %1982 = dma.done.wait [#allocation4], 64  }
   0x9   :  { %1983 = vsyncadd [#allocation4], 4294967232  ;;  %vm95_vm0 = vcmask 1043456   ;;  %s2670_s23 = sld [smem:[#allocation8_spill]]  ;;  %vm88_vm1 = vcmask 97280   ;;  %v124_v3 = vld [vmem:[%s2647_s4 + $0x10] sm:$0xff] }
   0xa   :  { %s2671_s5 = sld [smem:[#allocation6_spill]]  ;;  %145 = vmatpush.msra.mxu1 %v124_v3  ;;  %v123_v5 = vld [vmem:[%s2647_s4 + $0x8] sm:$0xff]  ;;  %v122_v6 = vld [vmem:[%s2647_s4] sm:$0xff]  ;;  %v158_v7 = vld [vmem:[%s2649_s6 + $0x18] sm:$0xff]  ;;  %vm125_vm2 = vcmask 195584   ;;  %v1985_v16 = vmov 3  }
   0xb   :  { %v157_v8 = vld [vmem:[%s2649_s6 + $0x10] sm:$0xff]  ;;  %178 = vmatpush.msra.mxu2 %v158_v7  ;;  %1777 = vmatpush.msra.mxu3 %v158_v7  ;;  %v156_v9 = vld [vmem:[%s2649_s6 + $0x8] sm:$0xff]  ;;  %v155_v15 = vld [vmem:[%s2649_s6] sm:$0xff]  ;;  %v1986_v17 = vmov 0   ;;  %vm159_vm3 = vcmask 261120   ;;  %v1987_v23 = vmov 2  }
   0xc   :  { %146 = vmatpush.msra.mxu1 %v123_v5  ;;  %1799 = vset.pattern.permute.xlu0 %v1985_v16  ;;  %v189_v20 = vld [vmem:[#allocation3] sm:$0xf]  ;;  %v1988_v24 = vmov 1   ;;  %s2673_s0 = sld [smem:[#allocation7_spill]]  ;;  %vm236_vm6 = vcmask 130048   ;;  %s1990_s24 = smov 104  }
   0xd   :  { %179 = vmatpush.msra.mxu2 %v157_v8  ;;  %1778 = vmatpush.msra.mxu3 %v157_v8  ;;  %s1991_s25 = smov 112   ;;  %s1992_s3 = smov 8  }
   0xe   :  { %147 = vmatpush.msra.mxu1 %v122_v6  ;;  %1801 = vset.pattern.permute.xlu2 %v1986_v17 }
   0xf   :  { %v83_v0 = vld [vmem:[%s2670_s23 + $0x8] sm:$0xf]  ;;  %v82_v1 = vld [vmem:[%s2670_s23] sm:$0xff]  ;;  %180 = vmatpush.msra.mxu2 %v156_v9  ;;  %1779 = vmatpush.msra.mxu3 %v156_v9  ;;  %s1989_s23 = smov 120  }
  0x10   :  { %1720 = vmatpush.msk.msra.mxu0 %vm95_vm0, %v83_v0  ;;  %v80_v2 = vld [vmem:[%s2671_s5] sm:$0xff]  ;;  %v81_v4 = vld [vmem:[%s2671_s5 + $0x8] sm:$0xff]  ;;  %s2672_s5 = sld [smem:[#allocation9_spill]]  ;;  %1803 = vset.pattern.permute.xlu1 %v1985_v16 }
  0x11   :  { %181 = vmatpush.msra.mxu2 %v155_v15  ;;  %1780 = vmatpush.msra.mxu3 %v155_v15 }
  0x12   :  { %114 = vmatpush.msra.mxu0 %v82_v1  ;;  %v2172_v30 = vld [vmem:[%s2673_s0 + $0x10] sm:$0xff]  ;;  %v2186_v39 = vld [vmem:[%s2673_s0 + $0x18] sm:$0xff]  ;;  %v2192_v45 = vld [vmem:[%s2673_s0] sm:$0xff] }
  0x13   :  { %1721 = vmatmul.msk.f32.vlgmr.msra.gmra.mxu0 %vm88_vm1, %v80_v2  ;;  %vm438_vm5 = vcmp.gt.f32.partialorder %v2172_v30, 0.0  ;;  %vm439_vm7 = vcmp.gt.f32.partialorder %v2186_v39, 0.0  ;;  %vm213_vm10 = vcmp.gt.f32.partialorder %v2192_v45, 0.0  ;;  %v2205_v56 = vld [vmem:[%s2673_s0 + $0x8] sm:$0xff] }
  0x14   :  { %vm214_vm12 = vcmp.gt.f32.partialorder %v2205_v56, 0.0 }
  0x16   :  { %v1844_v10 = vld [vmem:[%s2672_s5] ss:$0 sm:$0xff] }
  0x1b   :  { %1722 = vmatmul.msk.f32.gmra.mxu0 %vm88_vm1, %v81_v4 }
  0x90   :  { %v116_v11 = vpop.f32.mrf.mxu0 }
  0x91   :  { %v2130_v12 = vadd.f32 %v1844_v10, %v116_v11 }
  0x93   :  { %1723 = vmatmul.msk.f32.vlgmr.msra.gmra.mxu1 %vm125_vm2, %v2130_v12 }
  0x98   :  { %v119_v13 = vpop.f32.mrf.mxu0 }
  0x99   :  { %v2134_v14 = vadd.f32 %v1844_v10, %v119_v13 }
  0x9b   :  { %1724 = vmatmul.msk.f32.gmra.mxu1 %vm125_vm2, %v2134_v14 }
 0x110   :  { %v2144_v18 = vpop.f32.mrf.mxu1 }
 0x111   :  { %1725 = vmatmul.msk.f32.vlgmr.msra.gmra.mxu2 %vm159_vm3, %v2144_v18 }
 0x118   :  { %v2148_v19 = vpop.f32.mrf.mxu1 }
 0x119   :  { %1726 = vmatmul.msk.f32.vlgmr.msra.gmra.mxu3 %vm159_vm3, %v2148_v19 }
 0x11a   :  { %1727 = vmatpush.xpose.msk.msrb.mxu3 %vm159_vm3, %v2148_v19 }
 0x11e   :  { %1728 = vmatpush.xpose.msk.msrb.mxu3 %vm159_vm3, %v2144_v18 }
 0x121   :  { %1729 = vmatmul.msk.f32.vlgmr.msrb.gmra.mxu3 %vm159_vm3, %v189_v20 }
 0x122   :  { %309 = vmatpush.msra.mxu3 %v2148_v19 }
 0x124   :  { %310 = vmatpush.msra.mxu3 %v2144_v18 }
 0x194   :  { %v183_v21 = vpop.f32.mrf.mxu2 }
 0x195   :  { %217 = vperm.xlu2 %1801, %v183_v21   ;;  %550 = vperm.xlu0 %1799, %v183_v21  }
 0x19c   :  { %v186_v22 = vpop.f32.mrf.mxu3 }
 0x19d   :  { %1802 = vset.pattern.permute.xlu2 %v1987_v23  ;;  %1800 = vset.pattern.permute.xlu0 %v1988_v24 }
 0x19e   :  { %554 = vperm.xlu1 %1803, %v186_v22   ;;  %441 = vperm.xlu2 %1802, %v183_v21  }
 0x19f   :  { %322 = vperm.xlu0 %1800, %v183_v21  }
 0x1a4   :  { %v2166_v25 = vpop.f32.mrf.mxu3 }
 0x1a5   :  { %v557_v26 = vperm.slane %v2166_v25, 3  ;;  %v448_v34 = vperm.slane %v2166_v25, 2  ;;  %v329_v36 = vperm.slane %v2166_v25, 1  ;;  %v225_v47 = vperm.slane %v2166_v25, 0 }
 0x1a6   :  { %1804 = vset.pattern.permute.xlu1 %v1988_v24  ;;  %1823 = vset.pattern.permute.xlu2 %v1986_v17 }
 0x1a7   :  { %326 = vperm.xlu1 %1804, %v186_v22  }
 0x1af   :  { %1805 = vset.pattern.permute.xlu1 %v1986_v17 }
 0x1b0   :  { %222 = vperm.xlu1 %1805, %v186_v22  }
 0x1b8   :  { %1806 = vset.pattern.permute.xlu1 %v1987_v23 }
 0x1b9   :  { %445 = vperm.xlu1 %1806, %v186_v22  }
 0x1c1   :  { %1825 = vset.pattern.permute.xlu1 %v1985_v16 }
 0x1ef   :  { %v218_v27 = vpop.permute.xlu2 %217 }
 0x1f0   :  { %v226_v57 = vadd.f32 %v225_v47, %v218_v27 }
 0x1f2   :  { %v230_v62 = vmul.f32 0.2, %v226_v57  ;;  %vm228_vm14 = vcmp.gt.f32.partialorder %v226_v57, 0.0 }
 0x1f4   :  { %v232_v4 = vsel %vm228_vm14, %v226_v57, %v230_v62 }
 0x1f5   :  { %v234_v6 = vsel %vm213_vm10, %v232_v4, -1e+30 }
 0x1f6   :  { %v237_v8 = vsel %vm236_vm6, %v234_v6, -inf }
 0x1f8   :  { %v442_v37 = vpop.permute.xlu2 %441 }
 0x1f9   :  { %v449_v42 = vadd.f32 %v448_v34, %v442_v37 }
 0x1fb   :  { %v453_v49 = vmul.f32 0.2, %v449_v42  ;;  %vm451_vm11 = vcmp.gt.f32.partialorder %v449_v42, 0.0 }
 0x1fd   :  { %v455_v59 = vsel %vm451_vm11, %v449_v42, %v453_v49 }
 0x1fe   :  { %v2210_v61 = vsel %vm438_vm5, %v455_v59, -1e+30 }
 0x1ff   :  { %v459_v2 = vsel %vm236_vm6, %v2210_v61, -inf }
 0x207   :  { %v551_v28 = vpop.permute.xlu0 %550 }
 0x208   :  { %v558_v29 = vadd.f32 %v557_v26, %v551_v28 }
 0x20a   :  { %v562_v31 = vmul.f32 0.2, %v558_v29  ;;  %vm560_vm4 = vcmp.gt.f32.partialorder %v558_v29, 0.0 }
 0x20c   :  { %v564_v32 = vsel %vm560_vm4, %v558_v29, %v562_v31 }
 0x20d   :  { %v2177_v33 = vsel %vm438_vm5, %v564_v32, -1e+30 }
 0x20e   :  { %v568_v35 = vsel %vm236_vm6, %v2177_v33, -inf }
 0x20f   :  { %569 = vmax.xlane.f32.xlu2 %v568_v35 }
 0x210   :  { %v555_v38 = vpop.permute.xlu1 %554 }
 0x211   :  { %v559_v40 = vadd.f32 %v557_v26, %v555_v38  ;;  %v323_v41 = vpop.permute.xlu0 %322 }
 0x212   :  { %v330_v43 = vadd.f32 %v329_v36, %v323_v41 }
 0x213   :  { %v563_v44 = vmul.f32 0.2, %v559_v40  ;;  %vm561_vm8 = vcmp.gt.f32.partialorder %v559_v40, 0.0 }
 0x214   :  { %v334_v46 = vmul.f32 0.2, %v330_v43  ;;  %vm332_vm9 = vcmp.gt.f32.partialorder %v330_v43, 0.0 }
 0x215   :  { %v565_v48 = vsel %vm561_vm8, %v559_v40, %v563_v44 }
 0x216   :  { %v567_v50 = vsel %vm439_vm7, %v565_v48, -1e+30  ;;  %v336_v51 = vsel %vm332_vm9, %v330_v43, %v334_v46 }
 0x217   :  { %v571_v52 = vsel %vm236_vm6, %v567_v50, -inf  ;;  %v338_v53 = vsel %vm213_vm10, %v336_v51, -1e+30 }
 0x218   :  { %572 = vmax.xlane.f32.xlu1 %v571_v52  ;;  %v340_v54 = vsel %vm236_vm6, %v338_v53, -inf }
 0x219   :  { %v327_v55 = vpop.permute.xlu1 %326  ;;  %341 = vmax.xlane.f32.xlu0 %v340_v54 }
 0x21a   :  { %v331_v58 = vadd.f32 %v329_v36, %v327_v55 }
 0x21c   :  { %v335_v60 = vmul.f32 0.2, %v331_v58  ;;  %vm333_vm13 = vcmp.gt.f32.partialorder %v331_v58, 0.0 }
 0x21e   :  { %v337_v63 = vsel %vm333_vm13, %v331_v58, %v335_v60 }
 0x21f   :  { %v339_v0 = vsel %vm214_vm12, %v337_v63, -1e+30 }
 0x220   :  { %v343_v1 = vsel %vm236_vm6, %v339_v0, -inf }
 0x221   :  { %344 = vmax.xlane.f32.xlu2 %v343_v1  ;;  %460 = vmax.xlane.f32.xlu0 %v459_v2 }
 0x222   :  { %v223_v3 = vpop.permute.xlu1 %222 }
 0x223   :  { %v227_v5 = vadd.f32 %v225_v47, %v223_v3  ;;  %v1812_v3 = vpack.i.bf16 %v2144_v18, %v2148_v19 }
 0x225   :  { %v231_v7 = vmul.f32 0.2, %v227_v5  ;;  %vm229_vm15 = vcmp.gt.f32.partialorder %v227_v5, 0.0 }
 0x227   :  { %v233_v9 = vsel %vm229_vm15, %v227_v5, %v231_v7 }
 0x228   :  { %v235_v13 = vsel %vm214_vm12, %v233_v9, -1e+30 }
 0x229   :  { %238 = vmax.xlane.f32.xlu2 %v237_v8  ;;  %v240_v20 = vsel %vm236_vm6, %v235_v13, -inf }
 0x22b   :  { %v446_v10 = vpop.permute.xlu1 %445 }
 0x22c   :  { %v450_v11 = vadd.f32 %v448_v34, %v446_v10 }
 0x22e   :  { %v454_v15 = vmul.f32 0.2, %v450_v11  ;;  %vm452_vm0 = vcmp.gt.f32.partialorder %v450_v11, 0.0 }
 0x230   :  { %v456_v21 = vsel %vm452_vm0, %v450_v11, %v454_v15 }
 0x231   :  { %241 = vmax.xlane.f32.xlu2 %v240_v20  ;;  %v2225_v22 = vsel %vm439_vm7, %v456_v21, -1e+30 }
 0x232   :  { %v462_v25 = vsel %vm236_vm6, %v2225_v22, -inf }
 0x233   :  { %463 = vmax.xlane.f32.xlu0 %v462_v25 }
 0x282   :  { %v570_v26 = vpop.xlane.xlu2 %569 }
 0x283   :  { %v574_v27 = vsub.f32 %v2177_v33, %v570_v26 }
 0x285   :  { %v576_v28 = vmul.f32 1.442695, %v574_v27 }
 0x287   :  { %1848 = vpow2.f32 %v576_v28 }
 0x28b   :  { %v573_v29 = vpop.xlane.xlu1 %572 }
 0x28c   :  { %v575_v31 = vsub.f32 %v567_v50, %v573_v29  ;;  %v342_v32 = vpop.xlane.xlu0 %341 }
 0x28d   :  { %v1849_v34 = vpop.eup %1848  ;;  %v346_v35 = vsub.f32 %v338_v53, %v342_v32 }
 0x28e   :  { %v578_v36 = vmul.f32 1.442695, %v575_v31  ;;  %v2232_v37 = vsel %vm438_vm5, %v1849_v34, 0.0 }
 0x28f   :  { %v348_v38 = vmul.f32 1.442695, %v346_v35  ;;  %v582_v40 = vsel %vm236_vm6, %v2232_v37, 0.0 }
 0x290   :  { %1850 = vpow2.f32 %v578_v36  ;;  %583 = vadd.xlane.f32.xlu1 %v582_v40 }
 0x291   :  { %1852 = vpow2.f32 %v348_v38 }
 0x294   :  { %v345_v33 = vpop.xlane.xlu2 %344  ;;  %v461_v50 = vpop.xlane.xlu0 %460 }
 0x295   :  { %v347_v41 = vsub.f32 %v339_v0, %v345_v33  ;;  %v465_v52 = vsub.f32 %v2210_v61, %v461_v50 }
 0x296   :  { %v1851_v42 = vpop.eup %1850 }
 0x297   :  { %v1853_v43 = vpop.eup %1852  ;;  %v350_v44 = vmul.f32 1.442695, %v347_v41  ;;  %v2238_v46 = vsel %vm439_vm7, %v1851_v42, 0.0  ;;  %v467_v58 = vmul.f32 1.442695, %v465_v52 }
 0x298   :  { %v585_v47 = vsel %vm236_vm6, %v2238_v46, 0.0  ;;  %v2244_v48 = vsel %vm213_vm10, %v1853_v43, 0.0 }
 0x299   :  { %1854 = vpow2.f32 %v350_v44  ;;  %586 = vadd.xlane.f32.xlu0 %v585_v47  ;;  %v354_v49 = vsel %vm236_vm6, %v2244_v48, 0.0 }
 0x29a   :  { %355 = vadd.xlane.f32.xlu2 %v354_v49 }
 0x29c   :  { %v239_v51 = vpop.xlane.xlu2 %238 }
 0x29d   :  { %v243_v53 = vsub.f32 %v234_v6, %v239_v51 }
 0x29f   :  { %v1855_v54 = vpop.eup %1854  ;;  %v245_v55 = vmul.f32 1.442695, %v243_v53 }
 0x2a0   :  { %v2251_v57 = vsel %vm214_vm12, %v1855_v54, 0.0 }
 0x2a1   :  { %1856 = vpow2.f32 %v245_v55  ;;  %v357_v59 = vsel %vm236_vm6, %v2251_v57, 0.0 }
 0x2a2   :  { %358 = vadd.xlane.f32.xlu1 %v357_v59  ;;  %1858 = vpow2.f32 %v467_v58 }
 0x2a4   :  { %v242_v60 = vpop.xlane.xlu2 %241 }
 0x2a5   :  { %v244_v62 = vsub.f32 %v235_v13, %v242_v60 }
 0x2a6   :  { %v464_v19 = vpop.xlane.xlu0 %463 }
 0x2a7   :  { %v1857_v63 = vpop.eup %1856  ;;  %v247_v0 = vmul.f32 1.442695, %v244_v62  ;;  %v466_v8 = vsub.f32 %v2225_v22, %v464_v19 }
 0x2a8   :  { %v2257_v61 = vsel %vm213_vm10, %v1857_v63, 0.0  ;;  %v1859_v2 = vpop.eup %1858 }
 0x2a9   :  { %v251_v1 = vsel %vm236_vm6, %v2257_v61, 0.0  ;;  %1860 = vpow2.f32 %v247_v0  ;;  %v2266_v4 = vsel %vm438_vm5, %v1859_v2, 0.0  ;;  %v469_v9 = vmul.f32 1.442695, %v466_v8 }
 0x2aa   :  { %252 = vadd.xlane.f32.xlu1 %v251_v1  ;;  %v473_v5 = vsel %vm236_vm6, %v2266_v4, 0.0 }
 0x2ab   :  { %1862 = vpow2.f32 %v469_v9 }
 0x2ad   :  { %1813 = vrot.lane.b32.xlu0 %v1812_v3, %s1989_s23 }
 0x2af   :  { %v1861_v6 = vpop.eup %1860 }
 0x2b0   :  { %v2273_v7 = vsel %vm214_vm12, %v1861_v6, 0.0 }
 0x2b1   :  { %v254_v18 = vsel %vm236_vm6, %v2273_v7, 0.0  ;;  %v1863_v10 = vpop.eup %1862 }
 0x2b2   :  { %1808 = vrot.lane.b32.xlu2 %v1812_v3, %s1990_s24  ;;  %474 = vadd.xlane.f32.xlu1 %v473_v5  ;;  %v2281_v11 = vsel %vm439_vm7, %v1863_v10, 0.0 }
 0x2b3   :  { %v476_v13 = vsel %vm236_vm6, %v2281_v11, 0.0 }
 0x2ba   :  { %1818 = vrot.lane.b32.xlu2 %v1812_v3, %s1991_s25  ;;  %255 = vadd.xlane.f32.xlu1 %v254_v18 }
 0x2d7   :  { %477 = vadd.xlane.f32.xlu0 %v476_v13 }
 0x303   :  { %v584_v15 = vpop.xlane.xlu1 %583 }
 0x304   :  { %v588_v20 = vmax.f32 %v584_v15, 1e-30 }
 0x306   :  { %1864 = vrcp.f32 %v588_v20  ;;  %v601_v32 = vand.u32 2147483648, %v588_v20  ;;  %v599_v34 = vand.u32 2147483647, %v588_v20  ;;  %vm595_vm4 = vweird.f32 %v588_v20 }
 0x308   :  { %v602_v41 = vor.u32 1.1754944e-38, %v601_v32  ;;  %vm600_vm9 = vcmp.eq.f32.partialorder %v599_v34, 8.507059e+37 }
 0x30c   :  { %v1865_v21 = vpop.eup %1864  ;;  %v587_v25 = vpop.xlane.xlu0 %586 }
 0x30d   :  { %v591_v26 = vmul.f32 %v1865_v21, %v588_v20  ;;  %v589_v27 = vmax.f32 %v587_v25, 1e-30  ;;  %v356_v28 = vpop.xlane.xlu2 %355  ;;  %vm596_vm1 = vweird.f32 %v1865_v21 }
 0x30e   :  { %v2285_v22 = vmax.f32 %v356_v28, 1e-30  ;;  %vm597_vm8 = vmor %vm595_vm4, %vm596_vm1 }
 0x30f   :  { %v592_v29 = vsub.f32 1.0, %v591_v26  ;;  %1866 = vrcp.f32 %v589_v27  ;;  %v616_v55 = vand.u32 2147483648, %v589_v27  ;;  %v614_v59 = vand.u32 2147483647, %v589_v27 }
 0x310   :  { %1868 = vrcp.f32 %v2285_v22  ;;  %v373_v62 = vand.u32 2147483648, %v2285_v22  ;;  %vm610_vm14 = vweird.f32 %v589_v27  ;;  %vm367_vm15 = vweird.f32 %v2285_v22 }
 0x311   :  { %v593_v31 = vmul.f32 %v1865_v21, %v592_v29  ;;  %v371_v3 = vand.u32 2147483647, %v2285_v22  ;;  %vm615_vm1 = vcmp.eq.f32.partialorder %v614_v59, 8.507059e+37 }
 0x312   :  { %v374_v20 = vor.u32 1.1754944e-38, %v373_v62 }
 0x313   :  { %v594_v35 = vadd.f32 %v1865_v21, %v593_v31 }
 0x315   :  { %v1867_v36 = vpop.eup %1866  ;;  %v359_v38 = vpop.xlane.xlu1 %358  ;;  %v598_v33 = vsel %vm597_vm8, %v1865_v21, %v594_v35  ;;  %vm372_vm8 = vcmp.eq.f32.partialorder %v371_v3, 8.507059e+37 }
 0x316   :  { %v1809_v40 = vpop.permute.xlu2 %1808  ;;  %v1869_v42 = vpop.eup %1868  ;;  %v606_v43 = vmul.f32 %v1867_v36, %v589_v27  ;;  %v2288_v44 = vmax.f32 %v359_v38, 1e-30  ;;  %v603_v50 = vsel %vm600_vm9, %v602_v41, %v598_v33  ;;  %vm611_vm11 = vweird.f32 %v1867_v36 }
 0x317   :  { %v1810_v47 = vunpack.i.l.bf16 %v1809_v40  ;;  %v363_v49 = vmul.f32 %v1869_v42, %v2285_v22  ;;  %v1811_v52 = vunpack.i.h.bf16 %v1809_v40  ;;  %v604_v53 = vmul.f32 %v603_v50, %v2232_v37  ;;  %vm612_vm0 = vmor %vm610_vm14, %vm611_vm11 }
 0x318   :  { %v607_v51 = vsub.f32 1.0, %v606_v43  ;;  %1870 = vrcp.f32 %v2288_v44  ;;  %vm368_vm13 = vweird.f32 %v1869_v42  ;;  %v617_v37 = vor.u32 1.1754944e-38, %v616_v55 }
 0x319   :  { %646 = vmatpush.msrb.mxu2 %v1810_v47  ;;  %v364_v54 = vsub.f32 1.0, %v363_v49  ;;  %vm369_vm4 = vmor %vm367_vm15, %vm368_vm13  ;;  %v388_v29 = vand.u32 2147483648, %v2288_v44  ;;  %v386_v32 = vand.u32 2147483647, %v2288_v44  ;;  %vm382_vm11 = vweird.f32 %v2288_v44 }
 0x31a   :  { %v608_v58 = vmul.f32 %v1867_v36, %v607_v51 }
 0x31b   :  { %647 = vmatpush.msrb.mxu2 %v1811_v52  ;;  %v365_v60 = vmul.f32 %v1869_v42, %v364_v54  ;;  %v389_v33 = vor.u32 1.1754944e-38, %v388_v29  ;;  %vm387_vm14 = vcmp.eq.f32.partialorder %v386_v32, 8.507059e+37 }
 0x31c   :  { %1736 = vmatmul.msk.f32.vlgmr.msrb.gmra.mxu2 %vm236_vm6, %v604_v53  ;;  %v609_v63 = vadd.f32 %v1867_v36, %v608_v58 }
 0x31d   :  { %v253_v0 = vpop.xlane.xlu1 %252  ;;  %v366_v2 = vadd.f32 %v1869_v42, %v365_v60 }
 0x31e   :  { %v1819_v1 = vpop.permute.xlu2 %1818  ;;  %v1871_v5 = vpop.eup %1870  ;;  %v257_v6 = vmax.f32 %v253_v0, 1e-30  ;;  %v613_v19 = vsel %vm612_vm0, %v1867_v36, %v609_v63 }
 0x31f   :  { %v1820_v18 = vunpack.i.l.bf16 %v1819_v1  ;;  %v378_v8 = vmul.f32 %v1871_v5, %v2288_v44  ;;  %v1814_v9 = vpop.permute.xlu0 %1813  ;;  %v618_v10 = vsel %vm615_vm1, %v617_v37, %v613_v19  ;;  %v370_v13 = vsel %vm369_vm4, %v1869_v42, %v366_v2 }
 0x320   :  { %1872 = vrcp.f32 %v257_v6  ;;  %v1821_v15 = vunpack.i.h.bf16 %v1819_v1  ;;  %v1815_v25 = vunpack.i.l.bf16 %v1814_v9  ;;  %v619_v26 = vmul.f32 %v618_v10, %v2238_v46 }
 0x321   :  { %537 = vmatpush.msrb.mxu1 %v1820_v18  ;;  %v379_v21 = vsub.f32 1.0, %v378_v8  ;;  %v375_v27 = vsel %vm372_vm8, %v374_v20, %v370_v13  ;;  %v1816_v28 = vunpack.i.h.bf16 %v1814_v9  ;;  %vm383_vm9 = vweird.f32 %v1871_v5 }
 0x322   :  { %418 = vmatpush.msrb.mxu0 %v1815_v25  ;;  %v376_v31 = vmul.f32 %v375_v27, %v2244_v48  ;;  %vm384_vm13 = vmor %vm382_vm11, %vm383_vm9  ;;  %v270_v48 = vand.u32 2147483648, %v257_v6  ;;  %v268_v47 = vand.u32 2147483647, %v257_v6  ;;  %vm264_vm0 = vweird.f32 %v257_v6 }
 0x323   :  { %538 = vmatpush.msrb.mxu1 %v1821_v15  ;;  %v380_v22 = vmul.f32 %v1871_v5, %v379_v21 }
 0x324   :  { %1737 = vmatmul.msk.f32.gmra.mxu2 %vm236_vm6, %v619_v26  ;;  %419 = vmatpush.msrb.mxu0 %v1816_v28  ;;  %v271_v52 = vor.u32 1.1754944e-38, %v270_v48  ;;  %vm269_vm4 = vcmp.eq.f32.partialorder %v268_v47, 8.507059e+37  ;;  %v665_v48 = vld [vmem:[%s2650_s7] sm:$0xff] }
 0x325   :  { %v475_v34 = vpop.xlane.xlu1 %474  ;;  %v381_v35 = vadd.f32 %v1871_v5, %v380_v22  ;;  %1732 = vmatmul.msk.f32.vlgmr.msrb.gmra.mxu0 %vm236_vm6, %v376_v31 }
 0x326   :  { %v1873_v46 = vpop.eup %1872  ;;  %v479_v36 = vmax.f32 %v475_v34, 1e-30 }
 0x327   :  { %v260_v38 = vmul.f32 %v1873_v46, %v257_v6  ;;  %v385_v40 = vsel %vm384_vm13, %v1871_v5, %v381_v35  ;;  %vm265_vm15 = vweird.f32 %v1873_v46 }
 0x328   :  { %1874 = vrcp.f32 %v479_v36  ;;  %v390_v42 = vsel %vm387_vm14, %v389_v33, %v385_v40  ;;  %vm266_vm1 = vmor %vm264_vm0, %vm265_vm15  ;;  %v492_v62 = vand.u32 2147483648, %v479_v36  ;;  %vm486_vm9 = vweird.f32 %v479_v36 }
 0x329   :  { %v261_v41 = vsub.f32 1.0, %v260_v38  ;;  %v391_v49 = vmul.f32 %v390_v42, %v2251_v57  ;;  %v490_v57 = vand.u32 2147483647, %v479_v36  ;;  %v666_v42 = vld [vmem:[%s2650_s7 + $0x8] sm:$0xff] }
 0x32a   :  { %v493_v37 = vor.u32 1.1754944e-38, %v492_v62  ;;  %779 = vmatpush.msra.mxu1 %v666_v42  ;;  %695 = vmatpush.msrb.mxu3 %v666_v42  ;;  %v668_v62 = vld [vmem:[%s2652_s9] sm:$0xff] }
 0x32b   :  { %v262_v43 = vmul.f32 %v1873_v46, %v261_v41  ;;  %vm491_vm13 = vcmp.eq.f32.partialorder %v490_v57, 8.507059e+37 }
 0x32c   :  { %780 = vmatpush.msra.mxu1 %v665_v48  ;;  %696 = vmatpush.msrb.mxu3 %v665_v48 }
 0x32d   :  { %v263_v50 = vadd.f32 %v1873_v46, %v262_v43  ;;  %v256_v44 = vpop.xlane.xlu1 %255  ;;  %1733 = vmatmul.msk.f32.gmra.mxu0 %vm236_vm6, %v391_v49 }
 0x32e   :  { %v1875_v51 = vpop.eup %1874  ;;  %v258_v53 = vmax.f32 %v256_v44, 1e-30  ;;  %v865_v44 = vld [vmem:[%s2659_s16 + $0x10] sm:$0xff] }
 0x32f   :  { %v482_v54 = vmul.f32 %v1875_v51, %v479_v36  ;;  %v267_v55 = vsel %vm266_vm1, %v1873_v46, %v263_v50  ;;  %vm487_vm8 = vweird.f32 %v1875_v51 }
 0x330   :  { %1876 = vrcp.f32 %v258_v53  ;;  %v272_v58 = vsel %vm269_vm4, %v271_v52, %v267_v55  ;;  %vm488_vm11 = vmor %vm486_vm9, %vm487_vm8  ;;  %v285_v19 = vand.u32 2147483648, %v258_v53  ;;  %v283_v8 = vand.u32 2147483647, %v258_v53  ;;  %v863_v52 = vld [vmem:[%s2659_s16] sm:$0xff] }
 0x331   :  { %v483_v59 = vsub.f32 1.0, %v482_v54  ;;  %v273_v60 = vmul.f32 %v272_v58, %v2257_v61  ;;  %vm279_vm15 = vweird.f32 %v258_v53 }
 0x332   :  { %v286_v10 = vor.u32 1.1754944e-38, %v285_v19  ;;  %vm284_vm1 = vcmp.eq.f32.partialorder %v283_v8, 8.507059e+37 }
 0x333   :  { %v484_v63 = vmul.f32 %v1875_v51, %v483_v59  ;;  %1730 = vmatmul.msk.f32.vlgmr.msra.gmra.mxu3 %vm236_vm6, %v273_v60  ;;  %v669_v60 = vld [vmem:[%s2652_s9 + $0x8] sm:$0xff] }
 0x334   :  { %879 = vmatpush.msra.mxu3 %v865_v44  ;;  %810 = vmatpush.msra.mxu2 %v669_v60 }
 0x335   :  { %v485_v0 = vadd.f32 %v1875_v51, %v484_v63  ;;  %726 = vmatpush.msra.mxu0 %v669_v60  ;;  %v1845_v63 = vld [vmem:[%s2651_s8] ss:$0 sm:$0xff] }
 0x336   :  { %v1877_v1 = vpop.eup %1876  ;;  %811 = vmatpush.msra.mxu2 %v668_v62 }
 0x337   :  { %v275_v2 = vmul.f32 %v1877_v1, %v258_v53  ;;  %v489_v3 = vsel %vm488_vm11, %v1875_v51, %v485_v0  ;;  %vm280_vm14 = vweird.f32 %v1877_v1  ;;  %v864_v51 = vld [vmem:[%s2659_s16 + $0x8] sm:$0xff]  ;;  %727 = vmatpush.msra.mxu0 %v668_v62 }
 0x338   :  { %v494_v5 = vsel %vm491_vm13, %v493_v37, %v489_v3  ;;  %vm281_vm0 = vmor %vm279_vm15, %vm280_vm14  ;;  %vm318_vm13 = vcmask 64512   ;;  %vm435_vm14 = vcmask 130112   ;;  %880 = vmatpush.msra.mxu3 %v864_v51  ;;  %v904_v62 = vld [vmem:[%s2653_s10 + $0x8] sm:$0xff] }
 0x339   :  { %v276_v6 = vsub.f32 1.0, %v275_v2  ;;  %v495_v18 = vmul.f32 %v494_v5, %v2266_v4  ;;  %925 = vmatpush.msrb.mxu0 %v904_v62 }
 0x33a   :  { %881 = vmatpush.msra.mxu3 %v863_v52 }
 0x33b   :  { %1734 = vmatmul.msk.f32.vlgmr.msrb.gmra.mxu1 %vm236_vm6, %v495_v18  ;;  %v277_v61 = vmul.f32 %v1877_v1, %v276_v6 }
 0x33d   :  { %v278_v9 = vadd.f32 %v1877_v1, %v277_v61 }
 0x33f   :  { %v282_v13 = vsel %vm281_vm0, %v1877_v1, %v278_v9 }
 0x340   :  { %v287_v15 = vsel %vm284_vm1, %v286_v10, %v282_v13 }
 0x341   :  { %v288_v20 = vmul.f32 %v287_v15, %v2273_v7 }
 0x343   :  { %1731 = vmatmul.msk.f32.gmra.mxu3 %vm236_vm6, %v288_v20 }
 0x34a   :  { %v478_v21 = vpop.xlane.xlu0 %477 }
 0x34b   :  { %v480_v25 = vmax.f32 %v478_v21, 1e-30 }
 0x34d   :  { %1878 = vrcp.f32 %v480_v25  ;;  %v507_v28 = vand.u32 2147483648, %v480_v25  ;;  %v505_v29 = vand.u32 2147483647, %v480_v25  ;;  %vm501_vm8 = vweird.f32 %v480_v25 }
 0x34f   :  { %v508_v32 = vor.u32 1.1754944e-38, %v507_v28  ;;  %vm506_vm11 = vcmp.eq.f32.partialorder %v505_v29, 8.507059e+37 }
 0x353   :  { %v1879_v4 = vpop.eup %1878 }
 0x354   :  { %v497_v26 = vmul.f32 %v1879_v4, %v480_v25  ;;  %vm502_vm4 = vweird.f32 %v1879_v4 }
 0x355   :  { %vm503_vm9 = vmor %vm501_vm8, %vm502_vm4 }
 0x356   :  { %v498_v27 = vsub.f32 1.0, %v497_v26 }
 0x358   :  { %v499_v22 = vmul.f32 %v1879_v4, %v498_v27 }
 0x35a   :  { %v500_v31 = vadd.f32 %v1879_v4, %v499_v22 }
 0x35c   :  { %v504_v34 = vsel %vm503_vm9, %v1879_v4, %v500_v31 }
 0x35d   :  { %v509_v35 = vsel %vm506_vm11, %v508_v32, %v504_v34 }
 0x35e   :  { %v510_v7 = vmul.f32 %v509_v35, %v2281_v11 }
 0x360   :  { %1735 = vmatmul.msk.f32.gmra.mxu1 %vm236_vm6, %v510_v7 }
 0x39f   :  { %v649_v46 = vpop.f32.mrf.mxu2 }
 0x3a0   :  { %657 = vrot.lane.b32.xlu2 %v649_v46, %s1992_s3 }
 0x3a2   :  { %v421_v36 = vpop.f32.mrf.mxu0 }
 0x3a3   :  { %429 = vrot.lane.b32.xlu1 %v421_v36, %s1992_s3 }
 0x3a7   :  { %v652_v40 = vpop.f32.mrf.mxu2 }
 0x3aa   :  { %v424_v38 = vpop.f32.mrf.mxu0 }
 0x3ab   :  { %431 = vrot.lane.b32.xlu2 %v424_v38, %s1992_s3 }
 0x3b3   :  { %659 = vrot.lane.b32.xlu2 %v652_v40, %s1992_s3 }
 0x3b6   :  { %v312_v33 = vpop.f32.mrf.mxu3 }
 0x3b7   :  { %319 = vst.msk [vmem:[#allocation2] sm:$0xff] %vm318_vm13, %v312_v33  ;;  %v1993_v33 = vmov 16.0  }
 0x3b8   :  { %v540_v11 = vpop.f32.mrf.mxu1 }
 0x3b9   :  { %547 = vst.msk [vmem:[#allocation2 + $0x10] sm:$0xff] %vm318_vm13, %v540_v11 }
 0x3c6   :  { %v315_v41 = vpop.f32.mrf.mxu3 }
 0x3c7   :  { %320 = vst.msk [vmem:[#allocation2 + $0x8] sm:$0xff] %vm318_vm13, %v315_v41 }
 0x3dd   :  { %v543_v43 = vpop.f32.mrf.mxu1 }
 0x3de   :  { %548 = vst.msk [vmem:[#allocation2 + $0x18] sm:$0xff] %vm318_vm13, %v543_v43 }
 0x3fa   :  { %v658_v47 = vpop.permute.xlu2 %657 }
 0x3fb   :  { %663 = vst.msk [vmem:[#allocation2 + $0x10] sm:$0xff] %vm435_vm14, %v658_v47 }
 0x402   :  { %v2331_v49 = vld [vmem:[#allocation2 + $0x10] sm:$0xff] }
 0x403   :  { %1742 = vmatmul.msk.f32.vlgmr.msra.gmra.mxu1 %vm236_vm6, %v2331_v49 }
 0x405   :  { %v432_v50 = vpop.permute.xlu2 %431 }
 0x406   :  { %437 = vst.msk [vmem:[#allocation2 + $0x8] sm:$0xff] %vm435_vm14, %v432_v50 }
 0x40d   :  { %v660_v53 = vpop.permute.xlu2 %659  ;;  %v2355_v59 = vld [vmem:[#allocation2 + $0x8] sm:$0xff] }
 0x40e   :  { %664 = vst.msk [vmem:[#allocation2 + $0x18] sm:$0xff] %vm435_vm14, %v660_v53 }
 0x415   :  { %v430_v54 = vpop.permute.xlu1 %429  ;;  %v2346_v55 = vld [vmem:[#allocation2 + $0x18] sm:$0xff] }
 0x416   :  { %436 = vst.msk [vmem:[#allocation2] sm:$0xff] %vm435_vm14, %v430_v54  ;;  %1743 = vmatmul.msk.f32.gmra.mxu1 %vm236_vm6, %v2346_v55 }
 0x41d   :  { %v2351_v58 = vld [vmem:[#allocation2] sm:$0xff] }
 0x41e   :  { %1738 = vmatmul.msk.f32.vlgmr.msrb.gmra.mxu3 %vm236_vm6, %v2351_v58 }
 0x426   :  { %1739 = vmatmul.msk.f32.gmra.mxu3 %vm236_vm6, %v2355_v59 }
 0x42e   :  { %1746 = vmatmul.msk.f32.vlgmr.msra.gmra.mxu3 %vm125_vm2, %v2130_v12 }
 0x436   :  { %1747 = vmatmul.msk.f32.gmra.mxu3 %vm125_vm2, %v2134_v14  ;;  %vm735_vm2 = vcmask 7168  }
 0x480   :  { %v782_v12 = vpop.f32.mrf.mxu1 }
 0x481   :  { %v783_v57 = vadd.f32 %v1845_v63, %v782_v12 }
 0x483   :  { %1880 = vtanh.f32 %v783_v57 }
 0x489   :  { %v1881_v14 = vpop.eup %1880 }
 0x48a   :  { %1744 = vmatmul.msk.f32.vlgmr.msra.gmra.mxu2 %vm236_vm6, %v1881_v14 }
 0x493   :  { %v785_v0 = vpop.f32.mrf.mxu1 }
 0x494   :  { %v786_v1 = vadd.f32 %v1845_v63, %v785_v0 }
 0x496   :  { %1882 = vtanh.f32 %v786_v1 }
 0x49c   :  { %v1883_v37 = vpop.eup %1882 }
 0x49d   :  { %1745 = vmatmul.msk.f32.gmra.mxu2 %vm236_vm6, %v1883_v37 }
 0x4a1   :  { %v698_v2 = vpop.f32.mrf.mxu3 }
 0x4a2   :  { %v699_v3 = vadd.f32 %v1845_v63, %v698_v2 }
 0x4a4   :  { %1884 = vtanh.f32 %v699_v3 }
 0x4a9   :  { %v701_v5 = vpop.f32.mrf.mxu3 }
 0x4aa   :  { %v1885_v6 = vpop.eup %1884  ;;  %v702_v18 = vadd.f32 %v1845_v63, %v701_v5  ;;  %v903_v63 = vld [vmem:[%s2653_s10] sm:$0xff] }
 0x4ab   :  { %1740 = vmatmul.msk.f32.vlgmr.msra.gmra.mxu0 %vm236_vm6, %v1885_v6 }
 0x4ac   :  { %1886 = vtanh.f32 %v702_v18  ;;  %926 = vmatpush.msrb.mxu0 %v903_v63 }
 0x4ad   :  { %1888 = vrcp.f32 %v1993_v33  ;;  %v934_v33 = vld [vmem:[%s2655_s12] sm:$0xff] }
 0x4b2   :  { %v1887_v19 = vpop.eup %1886 }
 0x4b3   :  { %1741 = vmatmul.msk.f32.gmra.mxu0 %vm236_vm6, %v1887_v19  ;;  %v1889_v11 = vpop.eup %1888  ;;  %v883_v19 = vpop.f32.mrf.mxu3 }
 0x4b4   :  { %v750_v41 = vmul.f32 16.0, %v1889_v11  ;;  %vm754_vm15 = vweird.f32 %v1889_v11 }
 0x4b6   :  { %v751_v42 = vsub.f32 1.0, %v750_v41 }
 0x4b8   :  { %v752_v48 = vmul.f32 %v1889_v11, %v751_v42  ;;  %v967_v42 = vld [vmem:[%s2654_s11] sm:$0xf] }
 0x4ba   :  { %v753_v43 = vadd.f32 %v1889_v11, %v752_v48 }
 0x4bc   :  { %v2380_v47 = vsel %vm754_vm15, %v1889_v11, %v753_v43 }
 0x50d   :  { %v813_v61 = vpop.f32.mrf.mxu2 }
 0x50e   :  { %v819_v9 = vsel %vm735_vm2, %v813_v61, 0.0 }
 0x520   :  { %v816_v8 = vpop.f32.mrf.mxu2 }
 0x521   :  { %v820_v10 = vsel %vm735_vm2, %v816_v8, 0.0 }
 0x522   :  { %v821_v13 = vadd.f32 %v820_v10, %v819_v9  ;;  %v937_v10 = vld [vmem:[%s2655_s12 + $0x18] sm:$0xff] }
 0x523   :  { %956 = vmatpush.msrb.mxu1 %v937_v10 }
 0x524   :  { %822 = vadd.xlane.f32.xlu2 %v821_v13  ;;  %v936_v13 = vld [vmem:[%s2655_s12 + $0x10] sm:$0xff] }
 0x525   :  { %957 = vmatpush.msrb.mxu1 %v936_v13 }
 0x528   :  { %v729_v15 = vpop.f32.mrf.mxu0 }
 0x529   :  { %v736_v21 = vsel %vm735_vm2, %v729_v15, 0.0 }
 0x530   :  { %v732_v20 = vpop.f32.mrf.mxu0 }
 0x531   :  { %v737_v25 = vsel %vm735_vm2, %v732_v20, 0.0 }
 0x532   :  { %v738_v4 = vadd.f32 %v737_v25, %v736_v21  ;;  %v935_v25 = vld [vmem:[%s2655_s12 + $0x8] sm:$0xff] }
 0x533   :  { %958 = vmatpush.msrb.mxu1 %v935_v25 }
 0x534   :  { %739 = vadd.xlane.f32.xlu1 %v738_v4 }
 0x535   :  { %959 = vmatpush.msrb.mxu1 %v934_v33 }
 0x597   :  { %v823_v26 = vpop.xlane.xlu2 %822 }
 0x598   :  { %v824_v27 = vrot.slane %v823_v26, 4 }
 0x59a   :  { %v825_v28 = vadd.f32 %v824_v27, %v823_v26 }
 0x59c   :  { %v826_v22 = vrot.slane %v825_v28, 2 }
 0x59e   :  { %v827_v34 = vadd.f32 %v826_v22, %v825_v28 }
 0x5a0   :  { %v828_v46 = vrot.slane %v827_v34, 1 }
 0x5a2   :  { %v829_v40 = vadd.f32 %v828_v46, %v827_v34 }
 0x5a7   :  { %v740_v29 = vpop.xlane.xlu1 %739 }
 0x5a8   :  { %v741_v31 = vrot.slane %v740_v29, 4 }
 0x5aa   :  { %v742_v32 = vadd.f32 %v741_v31, %v740_v29  ;;  %v886_v31 = vpop.f32.mrf.mxu3 }
 0x5ac   :  { %v743_v35 = vrot.slane %v742_v32, 2 }
 0x5ae   :  { %v744_v7 = vadd.f32 %v743_v35, %v742_v32 }
 0x5b0   :  { %v745_v36 = vrot.slane %v744_v7, 1 }
 0x5b2   :  { %v746_v38 = vadd.f32 %v745_v36, %v744_v7 }
 0x5b4   :  { %1781 = vpush %v746_v38 }
 0x5b5   :  { %1783 = vpush %v829_v40 }
 0x5e5   :  { %s1782_s8 = spop %1781 }
 0x5e6   :  { %v748_v50 = vstv %s1782_s8  ;;  %s1784_s9 = spop %1783 }
 0x5e7   :  { %v756_v44 = vmul.f32 %v2380_v47, %v748_v50  ;;  %v831_v51 = vstv %s1784_s9 }
 0x5e8   :  { %v832_v52 = vmul.f32 %v831_v51, %v2380_v47 }
 0x5ea   :  { %v833_v53 = vmax.f32 %v756_v44, %v832_v52 }
 0x5ec   :  { %v834_v54 = vsub.f32 %v756_v44, %v833_v53  ;;  %v837_v60 = vsub.f32 %v832_v52, %v833_v53 }
 0x5ee   :  { %v835_v12 = vmul.f32 1.442695, %v834_v54  ;;  %v838_v57 = vmul.f32 1.442695, %v837_v60 }
 0x5f0   :  { %1890 = vpow2.f32 %v835_v12 }
 0x5f1   :  { %1892 = vpow2.f32 %v838_v57 }
 0x5f6   :  { %v1891_v14 = vpop.eup %1890 }
 0x5f7   :  { %v1893_v0 = vpop.eup %1892 }
 0x5f8   :  { %v840_v1 = vadd.f32 %v1893_v0, %v1891_v14 }
 0x5fa   :  { %1894 = vrcp.f32 %v840_v1  ;;  %v852_v5 = vand.u32 2147483648, %v840_v1  ;;  %v850_v18 = vand.u32 2147483647, %v840_v1  ;;  %vm846_vm1 = vweird.f32 %v840_v1 }
 0x5fc   :  { %v853_v8 = vor.u32 1.1754944e-38, %v852_v5  ;;  %vm851_vm8 = vcmp.eq.f32.partialorder %v850_v18, 8.507059e+37 }
 0x600   :  { %v1895_v37 = vpop.eup %1894 }
 0x601   :  { %v842_v2 = vmul.f32 %v1895_v37, %v840_v1  ;;  %vm847_vm0 = vweird.f32 %v1895_v37 }
 0x602   :  { %vm848_vm4 = vmor %vm846_vm1, %vm847_vm0 }
 0x603   :  { %v843_v3 = vsub.f32 1.0, %v842_v2 }
 0x605   :  { %v844_v6 = vmul.f32 %v1895_v37, %v843_v3 }
 0x607   :  { %v845_v61 = vadd.f32 %v1895_v37, %v844_v6 }
 0x609   :  { %v849_v9 = vsel %vm848_vm4, %v1895_v37, %v845_v61 }
 0x60a   :  { %v854_v15 = vsel %vm851_vm8, %v853_v8, %v849_v9 }
 0x60b   :  { %v855_v20 = vmul.f32 %v1891_v14, %v854_v15  ;;  %v858_v21 = vmul.f32 %v1893_v0, %v854_v15 }
 0x60d   :  { %v859_v4 = vmul.f32 %v858_v21, %v2331_v49  ;;  %v856_v26 = vmul.f32 %v855_v20, %v2351_v58  ;;  %v857_v27 = vmul.f32 %v855_v20, %v2355_v59  ;;  %v860_v28 = vmul.f32 %v858_v21, %v2346_v55 }
 0x60f   :  { %v861_v22 = vadd.f32 %v859_v4, %v856_v26  ;;  %v862_v29 = vadd.f32 %v860_v28, %v857_v27 }
 0x611   :  { %v889_v32 = vadd.f32 %v883_v19, %v861_v22  ;;  %v890_v34 = vadd.f32 %v886_v31, %v862_v29 }
 0x613   :  { %v893_v35 = vmin.f32 %v889_v32, 0.0  ;;  %v894_v7 = vmin.f32 %v890_v34, 0.0  ;;  %vm891_vm9 = vcmp.gt.f32.partialorder %v889_v32, 0.0  ;;  %vm892_vm11 = vcmp.gt.f32.partialorder %v890_v34, 0.0 }
 0x615   :  { %v895_v46 = vmul.f32 1.442695, %v893_v35  ;;  %v897_v36 = vmul.f32 1.442695, %v894_v7 }
 0x617   :  { %1896 = vpow2.f32 %v895_v46 }
 0x618   :  { %1898 = vpow2.f32 %v897_v36 }
 0x61d   :  { %v1897_v38 = vpop.eup %1896 }
 0x61e   :  { %v1748_v49 = vadd.f32 -1.0, %v1897_v38  ;;  %v1899_v59 = vpop.eup %1898 }
 0x61f   :  { %v1749_v55 = vadd.f32 -1.0, %v1899_v59 }
 0x620   :  { %v2403_v58 = vsel %vm891_vm9, %v889_v32, %v1748_v49 }
 0x621   :  { %1750 = vmatmul.msk.f32.vlgmr.msrb.gmra.mxu0 %vm236_vm6, %v2403_v58  ;;  %v2407_v40 = vsel %vm892_vm11, %v890_v34, %v1749_v55 }
 0x629   :  { %1751 = vmatmul.msk.f32.gmra.mxu0 %vm236_vm6, %v2407_v40 }
 0x69e   :  { %v2414_v11 = vpop.f32.mrf.mxu0 }
 0x69f   :  { %1752 = vmatmul.msk.f32.vlgmr.msrb.gmra.mxu1 %vm159_vm3, %v2414_v11 }
 0x6a6   :  { %v2418_v41 = vpop.f32.mrf.mxu0 }
 0x6a7   :  { %1753 = vmatmul.msk.f32.gmra.mxu1 %vm159_vm3, %v2418_v41  ;;  %1754 = vmatpush.xpose.msk.msrb.mxu2 %vm159_vm3, %v2418_v41  ;;  %v2466_v32 = vpack.i.bf16 %v2414_v11, %v2418_v41 }
 0x6ab   :  { %1755 = vmatpush.xpose.msk.msrb.mxu2 %vm159_vm3, %v2414_v11 }
 0x6ae   :  { %1756 = vmatmul.msk.f32.vlgmr.msrb.gmra.mxu2 %vm159_vm3, %v967_v42 }
 0x6af   :  { %1084 = vmatpush.msra.mxu2 %v2418_v41 }
 0x6b1   :  { %1085 = vmatpush.msra.mxu2 %v2414_v11 }
 0x71c   :  { %v961_v48 = vpop.f32.mrf.mxu1 }
 0x71d   :  { %993 = vperm.xlu2 %1823, %v961_v48   ;;  %1096 = vperm.xlu0 %1800, %v961_v48  }
 0x724   :  { %v964_v43 = vpop.f32.mrf.mxu1 }
 0x725   :  { %1822 = vset.pattern.permute.xlu0 %v1985_v16  ;;  %1324 = vperm.xlu1 %1825, %v964_v43  }
 0x726   :  { %1320 = vperm.xlu0 %1822, %v961_v48  }
 0x72e   :  { %1824 = vset.pattern.permute.xlu0 %v1988_v24 }
 0x72f   :  { %1100 = vperm.xlu0 %1824, %v964_v43  }
 0x731   :  { %v2437_v50 = vpop.f32.mrf.mxu2 }
 0x732   :  { %v1103_v44 = vperm.slane %v2437_v50, 1  ;;  %v1001_v37 = vperm.slane %v2437_v50, 0  ;;  %v1219_v31 = vperm.slane %v2437_v50, 2 }
 0x737   :  { %1826 = vset.pattern.permute.xlu0 %v1986_v17 }
 0x738   :  { %998 = vperm.xlu0 %1826, %v964_v43  }
 0x740   :  { %1827 = vset.pattern.permute.xlu0 %v1987_v23  ;;  %v1327_v23 = vperm.slane %v2437_v50, 3 }
 0x741   :  { %1212 = vperm.xlu0 %1827, %v961_v48  }
 0x749   :  { %1216 = vperm.xlu0 %1827, %v964_v43  }
 0x751   :  { %1843 = vset.pattern.permute.xlu0 %v1985_v16 }
 0x777   :  { %v994_v5 = vpop.permute.xlu2 %993 }
 0x778   :  { %v1002_v19 = vadd.f32 %v1001_v37, %v994_v5 }
 0x77a   :  { %v1006_v9 = vmul.f32 0.2, %v1002_v19  ;;  %vm1004_vm4 = vcmp.gt.f32.partialorder %v1002_v19, 0.0 }
 0x77c   :  { %v1008_v21 = vsel %vm1004_vm4, %v1002_v19, %v1006_v9 }
 0x77d   :  { %v1010_v26 = vsel %vm213_vm10, %v1008_v21, -1e+30 }
 0x77e   :  { %v1012_v28 = vsel %vm236_vm6, %v1010_v26, -inf }
 0x78f   :  { %v1097_v51 = vpop.permute.xlu0 %1096 }
 0x790   :  { %v1104_v52 = vadd.f32 %v1103_v44, %v1097_v51 }
 0x792   :  { %v1108_v53 = vmul.f32 0.2, %v1104_v52  ;;  %vm1106_vm3 = vcmp.gt.f32.partialorder %v1104_v52, 0.0 }
 0x794   :  { %v1110_v54 = vsel %vm1106_vm3, %v1104_v52, %v1108_v53 }
 0x795   :  { %v2442_v24 = vsel %vm213_vm10, %v1110_v54, -1e+30 }
 0x796   :  { %v1114_v17 = vsel %vm236_vm6, %v2442_v24, -inf }
 0x797   :  { %1115 = vmax.xlane.f32.xlu1 %v1114_v17  ;;  %v1325_v16 = vpop.permute.xlu1 %1324 }
 0x798   :  { %v1329_v60 = vadd.f32 %v1327_v23, %v1325_v16  ;;  %v1321_v62 = vpop.permute.xlu0 %1320 }
 0x799   :  { %v1328_v63 = vadd.f32 %v1327_v23, %v1321_v62 }
 0x79a   :  { %v1333_v12 = vmul.f32 0.2, %v1329_v60  ;;  %vm1331_vm15 = vcmp.gt.f32.partialorder %v1329_v60, 0.0 }
 0x79b   :  { %v1332_v57 = vmul.f32 0.2, %v1328_v63  ;;  %vm1330_vm0 = vcmp.gt.f32.partialorder %v1328_v63, 0.0 }
 0x79c   :  { %v1335_v14 = vsel %vm1331_vm15, %v1329_v60, %v1333_v12 }
 0x79d   :  { %v1337_v0 = vsel %vm439_vm7, %v1335_v14, -1e+30  ;;  %v1334_v1 = vsel %vm1330_vm0, %v1328_v63, %v1332_v57 }
 0x79e   :  { %v1341_v2 = vsel %vm236_vm6, %v1337_v0, -inf  ;;  %v1336_v3 = vsel %vm438_vm5, %v1334_v1, -1e+30 }
 0x79f   :  { %1342 = vmax.xlane.f32.xlu1 %v1341_v2  ;;  %v1338_v6 = vsel %vm236_vm6, %v1336_v3, -inf }
 0x7a0   :  { %1339 = vmax.xlane.f32.xlu0 %v1338_v6 }
 0x7a1   :  { %v1101_v18 = vpop.permute.xlu0 %1100 }
 0x7a2   :  { %v1105_v61 = vadd.f32 %v1103_v44, %v1101_v18 }
 0x7a4   :  { %v1109_v8 = vmul.f32 0.2, %v1105_v61  ;;  %vm1107_vm1 = vcmp.gt.f32.partialorder %v1105_v61, 0.0 }
 0x7a6   :  { %v1111_v10 = vsel %vm1107_vm1, %v1105_v61, %v1109_v8 }
 0x7a7   :  { %v1113_v13 = vsel %vm214_vm12, %v1111_v10, -1e+30 }
 0x7a8   :  { %v1117_v15 = vsel %vm236_vm6, %v1113_v13, -inf }
 0x7a9   :  { %1118 = vmax.xlane.f32.xlu2 %v1117_v15 }
 0x7aa   :  { %v999_v20 = vpop.permute.xlu0 %998 }
 0x7ab   :  { %v1003_v25 = vadd.f32 %v1001_v37, %v999_v20 }
 0x7ad   :  { %v1007_v4 = vmul.f32 0.2, %v1003_v25  ;;  %vm1005_vm8 = vcmp.gt.f32.partialorder %v1003_v25, 0.0 }
 0x7af   :  { %v1009_v27 = vsel %vm1005_vm8, %v1003_v25, %v1007_v4 }
 0x7b0   :  { %v1011_v22 = vsel %vm214_vm12, %v1009_v27, -1e+30 }
 0x7b1   :  { %1013 = vmax.xlane.f32.xlu2 %v1012_v28  ;;  %v1015_v29 = vsel %vm236_vm6, %v1011_v22, -inf }
 0x7b2   :  { %1016 = vmax.xlane.f32.xlu1 %v1015_v29 }
 0x7b3   :  { %v1213_v34 = vpop.permute.xlu0 %1212 }
 0x7b4   :  { %v1220_v35 = vadd.f32 %v1219_v31, %v1213_v34  ;;  %1829 = vrot.lane.b32.xlu0 %v2466_v32, %s1989_s23 }
 0x7b6   :  { %v1224_v7 = vmul.f32 0.2, %v1220_v35  ;;  %vm1222_vm9 = vcmp.gt.f32.partialorder %v1220_v35, 0.0 }
 0x7b8   :  { %v1226_v46 = vsel %vm1222_vm9, %v1220_v35, %v1224_v7 }
 0x7b9   :  { %v1228_v36 = vsel %vm438_vm5, %v1226_v46, -1e+30 }
 0x7ba   :  { %v1230_v38 = vsel %vm236_vm6, %v1228_v36, -inf }
 0x7bb   :  { %1231 = vmax.xlane.f32.xlu1 %v1230_v38  ;;  %v1217_v49 = vpop.permute.xlu0 %1216 }
 0x7bc   :  { %v1221_v59 = vadd.f32 %v1219_v31, %v1217_v49 }
 0x7be   :  { %v1225_v55 = vmul.f32 0.2, %v1221_v59  ;;  %vm1223_vm11 = vcmp.gt.f32.partialorder %v1221_v59, 0.0 }
 0x7c0   :  { %v1227_v33 = vsel %vm1223_vm11, %v1221_v59, %v1225_v55 }
 0x7c1   :  { %v1229_v11 = vsel %vm439_vm7, %v1227_v33, -1e+30 }
 0x7c2   :  { %v1233_v41 = vsel %vm236_vm6, %v1229_v11, -inf }
 0x7c3   :  { %1234 = vmax.xlane.f32.xlu1 %v1233_v41 }
 0x80a   :  { %v1116_v42 = vpop.xlane.xlu1 %1115 }
 0x80b   :  { %v1120_v48 = vsub.f32 %v2442_v24, %v1116_v42 }
 0x80d   :  { %v1122_v43 = vmul.f32 1.442695, %v1120_v48 }
 0x80f   :  { %1900 = vpow2.f32 %v1122_v43 }
 0x812   :  { %v1343_v50 = vpop.xlane.xlu1 %1342 }
 0x813   :  { %v1345_v44 = vsub.f32 %v1337_v0, %v1343_v50  ;;  %v1340_v51 = vpop.xlane.xlu0 %1339 }
 0x814   :  { %v1344_v52 = vsub.f32 %v1336_v3, %v1340_v51 }
 0x815   :  { %v1901_v53 = vpop.eup %1900  ;;  %v1348_v54 = vmul.f32 1.442695, %v1345_v44 }
 0x816   :  { %v1346_v17 = vmul.f32 1.442695, %v1344_v52  ;;  %v2479_v23 = vsel %vm213_vm10, %v1901_v53, 0.0 }
 0x817   :  { %1902 = vpow2.f32 %v1348_v54  ;;  %v1128_v16 = vsel %vm236_vm6, %v2479_v23, 0.0 }
 0x818   :  { %1904 = vpow2.f32 %v1346_v17  ;;  %1129 = vadd.xlane.f32.xlu2 %v1128_v16 }
 0x81c   :  { %v1119_v24 = vpop.xlane.xlu2 %1118 }
 0x81d   :  { %v1903_v60 = vpop.eup %1902  ;;  %v1121_v62 = vsub.f32 %v1113_v13, %v1119_v24 }
 0x81e   :  { %v1905_v63 = vpop.eup %1904  ;;  %v2485_v12 = vsel %vm439_vm7, %v1903_v60, 0.0 }
 0x81f   :  { %v1124_v57 = vmul.f32 1.442695, %v1121_v62  ;;  %v1355_v14 = vsel %vm236_vm6, %v2485_v12, 0.0  ;;  %v2491_v0 = vsel %vm438_vm5, %v1905_v63, 0.0 }
 0x820   :  { %1356 = vadd.xlane.f32.xlu1 %v1355_v14  ;;  %v1352_v1 = vsel %vm236_vm6, %v2491_v0, 0.0 }
 0x821   :  { %1906 = vpow2.f32 %v1124_v57  ;;  %1353 = vadd.xlane.f32.xlu2 %v1352_v1 }
 0x824   :  { %v1014_v37 = vpop.xlane.xlu2 %1013 }
 0x825   :  { %v1018_v2 = vsub.f32 %v1010_v26, %v1014_v37  ;;  %v1017_v3 = vpop.xlane.xlu1 %1016 }
 0x826   :  { %v1019_v5 = vsub.f32 %v1011_v22, %v1017_v3  ;;  %v1830_v6 = vpop.permute.xlu0 %1829 }
 0x827   :  { %v1907_v18 = vpop.eup %1906  ;;  %v1020_v19 = vmul.f32 1.442695, %v1018_v2  ;;  %v1831_v61 = vunpack.i.l.bf16 %v1830_v6  ;;  %v1832_v10 = vunpack.i.h.bf16 %v1830_v6 }
 0x828   :  { %v2497_v8 = vsel %vm214_vm12, %v1907_v18, 0.0  ;;  %v1022_v9 = vmul.f32 1.442695, %v1019_v5 }
 0x829   :  { %1908 = vpow2.f32 %v1020_v19  ;;  %1192 = vmatpush.msrb.mxu3 %v1831_v61  ;;  %v1131_v13 = vsel %vm236_vm6, %v2497_v8, 0.0 }
 0x82a   :  { %1132 = vadd.xlane.f32.xlu2 %v1131_v13  ;;  %1910 = vpow2.f32 %v1022_v9 }
 0x82b   :  { %1193 = vmatpush.msrb.mxu3 %v1832_v10 }
 0x82e   :  { %v1232_v15 = vpop.xlane.xlu1 %1231 }
 0x82f   :  { %v1909_v20 = vpop.eup %1908  ;;  %v1236_v21 = vsub.f32 %v1228_v36, %v1232_v15 }
 0x830   :  { %v2503_v25 = vsel %vm213_vm10, %v1909_v20, 0.0  ;;  %v1911_v27 = vpop.eup %1910 }
 0x831   :  { %v1238_v4 = vmul.f32 1.442695, %v1236_v21  ;;  %v1026_v26 = vsel %vm236_vm6, %v2503_v25, 0.0  ;;  %v2509_v22 = vsel %vm214_vm12, %v1911_v27, 0.0 }
 0x832   :  { %1027 = vadd.xlane.f32.xlu1 %v1026_v26  ;;  %v1029_v45 = vsel %vm236_vm6, %v2509_v22, 0.0 }
 0x833   :  { %1912 = vpow2.f32 %v1238_v4 }
 0x836   :  { %v1235_v28 = vpop.xlane.xlu1 %1234 }
 0x837   :  { %v1237_v29 = vsub.f32 %v1229_v11, %v1235_v28 }
 0x839   :  { %v1913_v31 = vpop.eup %1912  ;;  %v1240_v34 = vmul.f32 1.442695, %v1237_v29 }
 0x83a   :  { %1030 = vadd.xlane.f32.xlu1 %v1029_v45  ;;  %v2515_v35 = vsel %vm438_vm5, %v1913_v31, 0.0 }
 0x83b   :  { %1914 = vpow2.f32 %v1240_v34  ;;  %v1244_v7 = vsel %vm236_vm6, %v2515_v35, 0.0 }
 0x83c   :  { %1245 = vadd.xlane.f32.xlu0 %v1244_v7 }
 0x841   :  { %v1915_v46 = vpop.eup %1914 }
 0x842   :  { %1834 = vrot.lane.b32.xlu2 %v2466_v32, %s1990_s24  ;;  %v2523_v56 = vsel %vm439_vm7, %v1915_v46, 0.0 }
 0x843   :  { %v1247_v36 = vsel %vm236_vm6, %v2523_v56, 0.0 }
 0x844   :  { %1248 = vadd.xlane.f32.xlu1 %v1247_v36 }
 0x84a   :  { %1839 = vrot.lane.b32.xlu2 %v2466_v32, %s1991_s25 }
 0x88b   :  { %v1130_v30 = vpop.xlane.xlu2 %1129 }
 0x88c   :  { %v1134_v38 = vmax.f32 %v1130_v30, 1e-30 }
 0x88e   :  { %1916 = vrcp.f32 %v1134_v38  ;;  %v1147_v42 = vand.u32 2147483648, %v1134_v38  ;;  %v1145_v43 = vand.u32 2147483647, %v1134_v38  ;;  %vm1141_vm7 = vweird.f32 %v1134_v38 }
 0x890   :  { %v1148_v44 = vor.u32 1.1754944e-38, %v1147_v42  ;;  %vm1146_vm12 = vcmp.eq.f32.partialorder %v1145_v43, 8.507059e+37 }
 0x893   :  { %v1357_v49 = vpop.xlane.xlu1 %1356 }
 0x894   :  { %v1917_v59 = vpop.eup %1916  ;;  %v2529_v55 = vmax.f32 %v1357_v49, 1e-30  ;;  %v1354_v33 = vpop.xlane.xlu2 %1353 }
 0x895   :  { %v1137_v11 = vmul.f32 %v1917_v59, %v1134_v38  ;;  %v1358_v41 = vmax.f32 %v1354_v33, 1e-30  ;;  %vm1142_vm5 = vweird.f32 %v1917_v59 }
 0x896   :  { %1918 = vrcp.f32 %v2529_v55  ;;  %vm1143_vm10 = vmor %vm1141_vm7, %vm1142_vm5  ;;  %v1386_v20 = vand.u32 2147483648, %v2529_v55  ;;  %vm1380_vm8 = vweird.f32 %v2529_v55  ;;  %v1384_v26 = vand.u32 2147483647, %v2529_v55 }
 0x897   :  { %v1138_v39 = vsub.f32 1.0, %v1137_v11  ;;  %1920 = vrcp.f32 %v1358_v41  ;;  %v1371_v57 = vand.u32 2147483648, %v1358_v41  ;;  %v1369_v1 = vand.u32 2147483647, %v1358_v41 }
 0x898   :  { %vm1365_vm15 = vweird.f32 %v1358_v41  ;;  %vm1385_vm7 = vcmp.eq.f32.partialorder %v1384_v26, 8.507059e+37 }
 0x899   :  { %v1139_v48 = vmul.f32 %v1917_v59, %v1138_v39  ;;  %v1372_v3 = vor.u32 1.1754944e-38, %v1371_v57  ;;  %vm1370_vm1 = vcmp.eq.f32.partialorder %v1369_v1, 8.507059e+37 }
 0x89b   :  { %v1140_v50 = vadd.f32 %v1917_v59, %v1139_v48 }
 0x89c   :  { %v2532_v32 = vpop.eup %1918 }
 0x89d   :  { %v1921_v51 = vpop.eup %1920  ;;  %v1376_v52 = vmul.f32 %v2532_v32, %v2529_v55  ;;  %v1133_v53 = vpop.xlane.xlu2 %1132  ;;  %v1144_v54 = vsel %vm1143_vm10, %v1917_v59, %v1140_v50  ;;  %vm1381_vm4 = vweird.f32 %v2532_v32 }
 0x89e   :  { %v1361_v17 = vmul.f32 %v1921_v51, %v1358_v41  ;;  %v1135_v16 = vmax.f32 %v1133_v53, 1e-30  ;;  %v1149_v24 = vsel %vm1146_vm12, %v1148_v44, %v1144_v54  ;;  %vm1366_vm3 = vweird.f32 %v1921_v51  ;;  %vm2545_vm9 = vmor %vm1380_vm8, %vm1381_vm4 }
 0x89f   :  { %v1377_v60 = vsub.f32 1.0, %v1376_v52  ;;  %v1150_v62 = vmul.f32 %v1149_v24, %v2479_v23  ;;  %vm1367_vm0 = vmor %vm1365_vm15, %vm1366_vm3 }
 0x8a0   :  { %v1362_v63 = vsub.f32 1.0, %v1361_v17  ;;  %1922 = vrcp.f32 %v1135_v16  ;;  %v1162_v27 = vand.u32 2147483648, %v1135_v16  ;;  %v1160_v31 = vand.u32 2147483647, %v1135_v16 }
 0x8a1   :  { %1759 = vmatmul.msk.f32.vlgmr.msrb.gmra.mxu3 %vm236_vm6, %v1150_v62  ;;  %v1378_v37 = vmul.f32 %v2532_v32, %v1377_v60  ;;  %vm1156_vm5 = vweird.f32 %v1135_v16 }
 0x8a2   :  { %v1363_v14 = vmul.f32 %v1921_v51, %v1362_v63  ;;  %v1163_v49 = vor.u32 1.1754944e-38, %v1162_v27  ;;  %vm1161_vm12 = vcmp.eq.f32.partialorder %v1160_v31, 8.507059e+37 }
 0x8a3   :  { %v1379_v13 = vadd.f32 %v2532_v32, %v1378_v37 }
 0x8a4   :  { %v1364_v2 = vadd.f32 %v1921_v51, %v1363_v14 }
 0x8a5   :  { %v1028_v5 = vpop.xlane.xlu1 %1027  ;;  %v1835_v6 = vpop.permute.xlu2 %1834  ;;  %v1383_v34 = vsel %vm2545_vm9, %v2532_v32, %v1379_v13 }
 0x8a6   :  { %v1923_v18 = vpop.eup %1922  ;;  %v1032_v19 = vmax.f32 %v1028_v5, 1e-30  ;;  %v1836_v23 = vunpack.i.l.bf16 %v1835_v6  ;;  %v1368_v61 = vsel %vm1367_vm0, %v1921_v51, %v1364_v2  ;;  %v1837_v15 = vunpack.i.h.bf16 %v1835_v6 }
 0x8a7   :  { %v1152_v9 = vmul.f32 %v1923_v18, %v1135_v16  ;;  %v1373_v10 = vsel %vm1370_vm1, %v1372_v3, %v1368_v61  ;;  %vm1157_vm11 = vweird.f32 %v1923_v18 }
 0x8a8   :  { %1924 = vrcp.f32 %v1032_v19  ;;  %1416 = vmatpush.msra.mxu1 %v1836_v23  ;;  %v1374_v4 = vmul.f32 %v1373_v10, %v2491_v0  ;;  %v1387_v0 = vor.u32 1.1754944e-38, %v1386_v20  ;;  %vm1158_vm10 = vmor %vm1156_vm5, %vm1157_vm11  ;;  %v1045_v32 = vand.u32 2147483648, %v1032_v19 }
 0x8a9   :  { %v1153_v21 = vsub.f32 1.0, %v1152_v9  ;;  %v1043_v51 = vand.u32 2147483647, %v1032_v19  ;;  %vm1039_vm15 = vweird.f32 %v1032_v19 }
 0x8aa   :  { %1417 = vmatpush.msra.mxu1 %v1837_v15  ;;  %v1388_v59 = vsel %vm1385_vm7, %v1387_v0, %v1383_v34  ;;  %v1046_v54 = vor.u32 1.1754944e-38, %v1045_v32  ;;  %v1439_v32 = vld [vmem:[%s2658_s15 + $0x8] sm:$0xff] }
 0x8ab   :  { %1763 = vmatmul.msk.f32.vlgmr.msra.gmra.mxu1 %vm236_vm6, %v1374_v4  ;;  %v1154_v29 = vmul.f32 %v1923_v18, %v1153_v21  ;;  %v1389_v50 = vmul.f32 %v1388_v59, %v2485_v12  ;;  %vm1044_vm1 = vcmp.eq.f32.partialorder %v1043_v51, 8.507059e+37  ;;  %v1436_v59 = vld [vmem:[%s2656_s13 + $0x8] sm:$0xff]  ;;  %1496 = vmatpush.msra.mxu3 %v1439_v32  ;;  %v1846_v51 = vld [vmem:[%s2657_s14] ss:$0 sm:$0xff] }
 0x8ac   :  { %1465 = vmatpush.msrb.mxu2 %v1436_v59  ;;  %1572 = vmatpush.msrb.mxu1 %v1439_v32 }
 0x8ad   :  { %v1031_v45 = vpop.xlane.xlu1 %1030  ;;  %v1840_v7 = vpop.permute.xlu2 %1839  ;;  %v1155_v46 = vadd.f32 %v1923_v18, %v1154_v29 }
 0x8ae   :  { %v1925_v36 = vpop.eup %1924  ;;  %v1033_v30 = vmax.f32 %v1031_v45, 1e-30  ;;  %v1841_v38 = vunpack.i.l.bf16 %v1840_v7  ;;  %v1842_v41 = vunpack.i.h.bf16 %v1840_v7 }
 0x8af   :  { %v1035_v55 = vmul.f32 %v1925_v36, %v1032_v19  ;;  %v1246_v33 = vpop.xlane.xlu0 %1245  ;;  %v1159_v11 = vsel %vm1158_vm10, %v1923_v18, %v1155_v46  ;;  %vm1040_vm3 = vweird.f32 %v1925_v36 }
 0x8b0   :  { %1926 = vrcp.f32 %v1033_v30  ;;  %v1250_v39 = vmax.f32 %v1246_v33, 1e-30  ;;  %1308 = vmatpush.msra.mxu0 %v1841_v38  ;;  %v1164_v42 = vsel %vm1161_vm12, %v1163_v49, %v1159_v11  ;;  %vm1041_vm0 = vmor %vm1039_vm15, %vm1040_vm3  ;;  %v1060_v14 = vand.u32 2147483648, %v1033_v30 }
 0x8b1   :  { %v1036_v48 = vsub.f32 1.0, %v1035_v55  ;;  %v1165_v43 = vmul.f32 %v1164_v42, %v2497_v8  ;;  %v1058_v2 = vand.u32 2147483647, %v1033_v30  ;;  %vm1054_vm8 = vweird.f32 %v1033_v30  ;;  %v1435_v55 = vld [vmem:[%s2656_s13] sm:$0xff] }
 0x8b2   :  { %1928 = vrcp.f32 %v1250_v39  ;;  %1309 = vmatpush.msra.mxu0 %v1842_v41  ;;  %v1263_v3 = vand.u32 2147483648, %v1250_v39  ;;  %v1261_v6 = vand.u32 2147483647, %v1250_v39  ;;  %v1061_v19 = vor.u32 1.1754944e-38, %v1060_v14  ;;  %1466 = vmatpush.msrb.mxu2 %v1435_v55 }
 0x8b3   :  { %v1037_v44 = vmul.f32 %v1925_v36, %v1036_v48  ;;  %1760 = vmatmul.msk.f32.gmra.mxu3 %vm236_vm6, %v1165_v43  ;;  %1764 = vmatmul.msk.f32.gmra.mxu1 %vm236_vm6, %v1389_v50  ;;  %vm1257_vm5 = vweird.f32 %v1250_v39  ;;  %vm1059_vm7 = vcmp.eq.f32.partialorder %v1058_v2, 8.507059e+37 }
 0x8b4   :  { %v1264_v9 = vor.u32 1.1754944e-38, %v1263_v3  ;;  %vm1262_vm12 = vcmp.eq.f32.partialorder %v1261_v6, 8.507059e+37  ;;  %1541 = vmatpush.msrb.mxu0 %v1436_v59 }
 0x8b5   :  { %v1038_v52 = vadd.f32 %v1925_v36, %v1037_v44  ;;  %v1438_v44 = vld [vmem:[%s2658_s15] sm:$0xff] }
 0x8b6   :  { %v1927_v53 = vpop.eup %1926  ;;  %1542 = vmatpush.msrb.mxu0 %v1435_v55  ;;  %1573 = vmatpush.msrb.mxu1 %v1438_v44 }
 0x8b7   :  { %v1050_v17 = vmul.f32 %v1927_v53, %v1033_v30  ;;  %v1249_v8 = vpop.xlane.xlu1 %1248  ;;  %v1042_v16 = vsel %vm1041_vm0, %v1925_v36, %v1038_v52  ;;  %vm1055_vm4 = vweird.f32 %v1927_v53  ;;  %1497 = vmatpush.msra.mxu3 %v1438_v44 }
 0x8b8   :  { %v1929_v12 = vpop.eup %1928  ;;  %v1251_v24 = vmax.f32 %v1249_v8, 1e-30  ;;  %v1047_v60 = vsel %vm1044_vm1, %v1046_v54, %v1042_v16  ;;  %vm1056_vm11 = vmor %vm1054_vm8, %vm1055_vm4 }
 0x8b9   :  { %v1051_v62 = vsub.f32 1.0, %v1050_v17  ;;  %v1253_v63 = vmul.f32 %v1929_v12, %v1250_v39  ;;  %v1048_v57 = vmul.f32 %v1047_v60, %v2503_v25  ;;  %vm1258_vm9 = vweird.f32 %v1929_v12 }
 0x8ba   :  { %1930 = vrcp.f32 %v1251_v24  ;;  %vm1259_vm10 = vmor %vm1257_vm5, %vm1258_vm9  ;;  %v1278_v27 = vand.u32 2147483648, %v1251_v24  ;;  %v1276_v29 = vand.u32 2147483647, %v1251_v24  ;;  %vm1272_vm15 = vweird.f32 %v1251_v24 }
 0x8bb   :  { %v1254_v1 = vsub.f32 1.0, %v1253_v63  ;;  %1757 = vmatmul.msk.f32.vlgmr.msra.gmra.mxu2 %vm236_vm6, %v1048_v57  ;;  %v1052_v37 = vmul.f32 %v1927_v53, %v1051_v62 }
 0x8bc   :  { %v1279_v34 = vor.u32 1.1754944e-38, %v1278_v27  ;;  %vm1277_vm1 = vcmp.eq.f32.partialorder %v1276_v29, 8.507059e+37 }
 0x8bd   :  { %v1255_v5 = vmul.f32 %v1929_v12, %v1254_v1  ;;  %v1053_v18 = vadd.f32 %v1927_v53, %v1052_v37 }
 0x8bf   :  { %v1256_v23 = vadd.f32 %v1929_v12, %v1255_v5  ;;  %v1057_v61 = vsel %vm1056_vm11, %v1927_v53, %v1053_v18 }
 0x8c0   :  { %v1931_v25 = vpop.eup %1930  ;;  %v1062_v10 = vsel %vm1059_vm7, %v1061_v19, %v1057_v61  ;;  %vm1712_vm7 = vcmask 31744  }
 0x8c1   :  { %v1268_v13 = vmul.f32 %v1931_v25, %v1251_v24  ;;  %v1063_v15 = vmul.f32 %v1062_v10, %v2509_v22  ;;  %v1260_v20 = vsel %vm1259_vm10, %v1929_v12, %v1256_v23  ;;  %vm1273_vm3 = vweird.f32 %v1931_v25 }
 0x8c2   :  { %v1265_v21 = vsel %vm1262_vm12, %v1264_v9, %v1260_v20  ;;  %vm1274_vm0 = vmor %vm1272_vm15, %vm1273_vm3 }
 0x8c3   :  { %v1269_v4 = vsub.f32 1.0, %v1268_v13  ;;  %1758 = vmatmul.msk.f32.gmra.mxu2 %vm236_vm6, %v1063_v15  ;;  %v1266_v26 = vmul.f32 %v1265_v21, %v2515_v35 }
 0x8c5   :  { %1761 = vmatmul.msk.f32.vlgmr.msra.gmra.mxu0 %vm236_vm6, %v1266_v26  ;;  %v1270_v28 = vmul.f32 %v1931_v25, %v1269_v4 }
 0x8c7   :  { %v1271_v31 = vadd.f32 %v1931_v25, %v1270_v28 }
 0x8c9   :  { %v1275_v0 = vsel %vm1274_vm0, %v1931_v25, %v1271_v31 }
 0x8ca   :  { %v1280_v22 = vsel %vm1277_vm1, %v1279_v34, %v1275_v0 }
 0x8cb   :  { %v1281_v45 = vmul.f32 %v1280_v22, %v2523_v56 }
 0x8cd   :  { %1762 = vmatmul.msk.f32.gmra.mxu0 %vm236_vm6, %v1281_v45 }
 0x924   :  { %v1195_v7 = vpop.f32.mrf.mxu3 }
 0x925   :  { %1203 = vrot.lane.b32.xlu1 %v1195_v7, %s1992_s3 }
 0x928   :  { %v1419_v46 = vpop.f32.mrf.mxu1 }
 0x930   :  { %v1422_v38 = vpop.f32.mrf.mxu1 }
 0x936   :  { %v1198_v35 = vpop.f32.mrf.mxu3 }
 0x937   :  { %1205 = vrot.lane.b32.xlu2 %v1198_v35, %s1992_s3 }
 0x93e   :  { %v1087_v36 = vpop.f32.mrf.mxu2 }
 0x93f   :  { %1093 = vst.msk [vmem:[#allocation2] sm:$0xff] %vm318_vm13, %v1087_v36  ;;  %1427 = vrot.lane.b32.xlu2 %v1419_v46, %s1992_s3  ;;  %v1640_v36 = vld [vmem:[%s2660_s17 + $0x8] sm:$0xff] }
 0x940   :  { %1665 = vmatpush.msra.mxu2 %v1640_v36 }
 0x942   :  { %v1311_v30 = vpop.f32.mrf.mxu0 }
 0x943   :  { %1317 = vst.msk [vmem:[#allocation2 + $0x10] sm:$0xff] %vm318_vm13, %v1311_v30  ;;  %v1639_v30 = vld [vmem:[%s2660_s17] sm:$0xff] }
 0x944   :  { %1666 = vmatpush.msra.mxu2 %v1639_v30 }
 0x946   :  { %v1090_v49 = vpop.f32.mrf.mxu2 }
 0x947   :  { %1094 = vst.msk [vmem:[#allocation2 + $0x8] sm:$0xff] %vm318_vm13, %v1090_v49  ;;  %1429 = vrot.lane.b32.xlu2 %v1422_v38, %s1992_s3 }
 0x94a   :  { %v1314_v56 = vpop.f32.mrf.mxu0 }
 0x94b   :  { %1318 = vst.msk [vmem:[#allocation2 + $0x18] sm:$0xff] %vm318_vm13, %v1314_v56 }
 0x991   :  { %v1206_v33 = vpop.permute.xlu2 %1205 }
 0x992   :  { %1210 = vst.msk [vmem:[#allocation2 + $0x8] sm:$0xff] %vm435_vm14, %v1206_v33 }
 0x997   :  { %v1204_v11 = vpop.permute.xlu1 %1203 }
 0x998   :  { %1209 = vst.msk [vmem:[#allocation2] sm:$0xff] %vm435_vm14, %v1204_v11 }
 0x999   :  { %v1428_v41 = vpop.permute.xlu2 %1427  ;;  %v2591_v43 = vld [vmem:[#allocation2 + $0x8] sm:$0xff] }
 0x99a   :  { %1433 = vst.msk [vmem:[#allocation2 + $0x10] sm:$0xff] %vm435_vm14, %v1428_v41 }
 0x99f   :  { %v2582_v39 = vld [vmem:[#allocation2] sm:$0xff] }
 0x9a0   :  { %1765 = vmatmul.msk.f32.vlgmr.msrb.gmra.mxu2 %vm236_vm6, %v2582_v39 }
 0x9a1   :  { %v1430_v42 = vpop.permute.xlu2 %1429  ;;  %v2586_v48 = vld [vmem:[#allocation2 + $0x10] sm:$0xff] }
 0x9a2   :  { %1434 = vst.msk [vmem:[#allocation2 + $0x18] sm:$0xff] %vm435_vm14, %v1430_v42  ;;  %1769 = vmatmul.msk.f32.vlgmr.msrb.gmra.mxu0 %vm236_vm6, %v2586_v48 }
 0x9a8   :  { %1766 = vmatmul.msk.f32.gmra.mxu2 %vm236_vm6, %v2591_v43 }
 0x9a9   :  { %v2595_v50 = vld [vmem:[#allocation2 + $0x18] sm:$0xff] }
 0x9aa   :  { %1770 = vmatmul.msk.f32.gmra.mxu0 %vm236_vm6, %v2595_v50 }
 0xa1f   :  { %v1544_v52 = vpop.f32.mrf.mxu0 }
 0xa20   :  { %v1545_v53 = vadd.f32 %v1846_v51, %v1544_v52 }
 0xa22   :  { %1932 = vtanh.f32 %v1545_v53 }
 0xa23   :  { %v1468_v54 = vpop.f32.mrf.mxu2 }
 0xa24   :  { %v1469_v17 = vadd.f32 %v1846_v51, %v1468_v54 }
 0xa26   :  { %1934 = vtanh.f32 %v1469_v17 }
 0xa27   :  { %v1547_v8 = vpop.f32.mrf.mxu0 }
 0xa28   :  { %v1933_v16 = vpop.eup %1932  ;;  %v1548_v12 = vadd.f32 %v1846_v51, %v1547_v8 }
 0xa29   :  { %1771 = vmatmul.msk.f32.vlgmr.msrb.gmra.mxu1 %vm236_vm6, %v1933_v16 }
 0xa2a   :  { %1936 = vtanh.f32 %v1548_v12 }
 0xa2b   :  { %v1471_v24 = vpop.f32.mrf.mxu2 }
 0xa2c   :  { %v1935_v60 = vpop.eup %1934  ;;  %v1472_v62 = vadd.f32 %v1846_v51, %v1471_v24 }
 0xa2d   :  { %1767 = vmatmul.msk.f32.vlgmr.msra.gmra.mxu3 %vm236_vm6, %v1935_v60 }
 0xa2e   :  { %1938 = vtanh.f32 %v1472_v62 }
 0xa30   :  { %v1937_v63 = vpop.eup %1936 }
 0xa31   :  { %1772 = vmatmul.msk.f32.gmra.mxu1 %vm236_vm6, %v1937_v63 }
 0xa34   :  { %v1939_v57 = vpop.eup %1938 }
 0xa35   :  { %1768 = vmatmul.msk.f32.gmra.mxu3 %vm236_vm6, %v1939_v57 }
 0xaa6   :  { %v1575_v14 = vpop.f32.mrf.mxu1 }
 0xaa7   :  { %v1581_v37 = vsel %vm735_vm2, %v1575_v14, 0.0 }
 0xaae   :  { %v1578_v1 = vpop.f32.mrf.mxu1 }
 0xaaf   :  { %v1582_v2 = vsel %vm735_vm2, %v1578_v1, 0.0 }
 0xab0   :  { %v1499_v3 = vpop.f32.mrf.mxu3  ;;  %v1583_v5 = vadd.f32 %v1582_v2, %v1581_v37 }
 0xab1   :  { %v1505_v18 = vsel %vm735_vm2, %v1499_v3, 0.0 }
 0xab2   :  { %1584 = vadd.xlane.f32.xlu2 %v1583_v5 }
 0xab8   :  { %v1502_v6 = vpop.f32.mrf.mxu3 }
 0xab9   :  { %v1506_v19 = vsel %vm735_vm2, %v1502_v6, 0.0 }
 0xaba   :  { %v1507_v23 = vadd.f32 %v1506_v19, %v1505_v18 }
 0xabc   :  { %1508 = vadd.xlane.f32.xlu1 %v1507_v23 }
 0xb25   :  { %v1585_v61 = vpop.xlane.xlu2 %1584 }
 0xb26   :  { %v1586_v25 = vrot.slane %v1585_v61, 4 }
 0xb28   :  { %v1587_v9 = vadd.f32 %v1586_v25, %v1585_v61 }
 0xb2a   :  { %v1588_v10 = vrot.slane %v1587_v9, 2 }
 0xb2c   :  { %v1589_v21 = vadd.f32 %v1588_v10, %v1587_v9 }
 0xb2e   :  { %v1590_v27 = vrot.slane %v1589_v21, 1 }
 0xb2f   :  { %v1509_v13 = vpop.xlane.xlu1 %1508 }
 0xb30   :  { %v1510_v15 = vrot.slane %v1509_v13, 4  ;;  %v1591_v31 = vadd.f32 %v1590_v27, %v1589_v21 }
 0xb32   :  { %v1511_v20 = vadd.f32 %v1510_v15, %v1509_v13 }
 0xb34   :  { %v1512_v4 = vrot.slane %v1511_v20, 2 }
 0xb36   :  { %v1513_v26 = vadd.f32 %v1512_v4, %v1511_v20 }
 0xb38   :  { %v1514_v28 = vrot.slane %v1513_v26, 1 }
 0xb3a   :  { %v1515_v29 = vadd.f32 %v1514_v28, %v1513_v26 }
 0xb3c   :  { %1785 = vpush %v1515_v29 }
 0xb3d   :  { %1787 = vpush %v1591_v31 }
 0xb6d   :  { %s1786_s14 = spop %1785 }
 0xb6e   :  { %v1517_v34 = vstv %s1786_s14  ;;  %s1788_s15 = spop %1787 }
 0xb6f   :  { %v1518_v0 = vmul.f32 %v1517_v34, %v2380_v47  ;;  %v1593_v22 = vstv %s1788_s15 }
 0xb70   :  { %v1594_v45 = vmul.f32 %v1593_v22, %v2380_v47 }
 0xb72   :  { %v1595_v7 = vmax.f32 %v1518_v0, %v1594_v45 }
 0xb74   :  { %v1596_v35 = vsub.f32 %v1518_v0, %v1595_v7  ;;  %v1599_v46 = vsub.f32 %v1594_v45, %v1595_v7 }
 0xb76   :  { %v1597_v38 = vmul.f32 1.442695, %v1596_v35  ;;  %v1600_v49 = vmul.f32 1.442695, %v1599_v46 }
 0xb78   :  { %1940 = vpow2.f32 %v1597_v38 }
 0xb79   :  { %1942 = vpow2.f32 %v1600_v49 }
 0xb7e   :  { %v1941_v56 = vpop.eup %1940 }
 0xb7f   :  { %v1943_v59 = vpop.eup %1942 }
 0xb80   :  { %v1602_v47 = vadd.f32 %v1943_v59, %v1941_v56 }
 0xb82   :  { %1944 = vrcp.f32 %v1602_v47  ;;  %v1614_v41 = vand.u32 2147483648, %v1602_v47  ;;  %v1612_v32 = vand.u32 2147483647, %v1602_v47  ;;  %vm1608_vm14 = vweird.f32 %v1602_v47 }
 0xb84   :  { %v1615_v51 = vor.u32 1.1754944e-38, %v1614_v41  ;;  %vm1613_vm4 = vcmp.eq.f32.partialorder %v1612_v32, 8.507059e+37 }
 0xb88   :  { %v1945_v55 = vpop.eup %1944 }
 0xb89   :  { %v1604_v33 = vmul.f32 %v1945_v55, %v1602_v47  ;;  %vm1609_vm13 = vweird.f32 %v1945_v55 }
 0xb8a   :  { %vm1610_vm2 = vmor %vm1608_vm14, %vm1609_vm13 }
 0xb8b   :  { %v1605_v11 = vsub.f32 1.0, %v1604_v33 }
 0xb8d   :  { %v1606_v42 = vmul.f32 %v1945_v55, %v1605_v11 }
 0xb8f   :  { %v1607_v44 = vadd.f32 %v1945_v55, %v1606_v42 }
 0xb91   :  { %v1611_v52 = vsel %vm1610_vm2, %v1945_v55, %v1607_v44 }
 0xb92   :  { %v1616_v53 = vsel %vm1613_vm4, %v1615_v51, %v1611_v52 }
 0xb93   :  { %v1617_v54 = vmul.f32 %v1941_v56, %v1616_v53  ;;  %v1620_v17 = vmul.f32 %v1943_v59, %v1616_v53 }
 0xb95   :  { %v1621_v8 = vmul.f32 %v1620_v17, %v2586_v48  ;;  %v1618_v16 = vmul.f32 %v1617_v54, %v2582_v39  ;;  %v1619_v12 = vmul.f32 %v1617_v54, %v2591_v43  ;;  %v1622_v24 = vmul.f32 %v1620_v17, %v2595_v50 }
 0xb97   :  { %v1623_v60 = vadd.f32 %v1621_v8, %v1618_v16  ;;  %v1624_v62 = vadd.f32 %v1622_v24, %v1619_v12 }
 0xb99   :  { %v1625_v63 = vadd.f32 %v1623_v60, %v2403_v58  ;;  %v1626_v57 = vadd.f32 %v1624_v62, %v2407_v40  ;;  %v1847_v58 = vld [vmem:[%s2661_s18] ss:$0 sm:$0xff] }
 0xb9b   :  { %v1629_v14 = vmin.f32 %v1625_v63, 0.0  ;;  %v1630_v1 = vmin.f32 %v1626_v57, 0.0  ;;  %vm1627_vm8 = vcmp.gt.f32.partialorder %v1625_v63, 0.0  ;;  %vm1628_vm9 = vcmp.gt.f32.partialorder %v1626_v57, 0.0 }
 0xb9d   :  { %v1631_v37 = vmul.f32 1.442695, %v1629_v14  ;;  %v1633_v2 = vmul.f32 1.442695, %v1630_v1 }
 0xb9f   :  { %1946 = vpow2.f32 %v1631_v37 }
 0xba0   :  { %1948 = vpow2.f32 %v1633_v2 }
 0xba5   :  { %v1947_v3 = vpop.eup %1946 }
 0xba6   :  { %v1773_v48 = vadd.f32 -1.0, %v1947_v3  ;;  %v1949_v5 = vpop.eup %1948 }
 0xba7   :  { %v1774_v43 = vadd.f32 -1.0, %v1949_v5 }
 0xba8   :  { %v1637_v39 = vsel %vm1627_vm8, %v1625_v63, %v1773_v48 }
 0xba9   :  { %1775 = vmatmul.msk.f32.vlgmr.msra.gmra.mxu2 %vm236_vm6, %v1637_v39  ;;  %v1638_v50 = vsel %vm1628_vm9, %v1626_v57, %v1774_v43 }
 0xbb1   :  { %1776 = vmatmul.msk.f32.gmra.mxu2 %vm236_vm6, %v1638_v50 }
 0xc2c   :  { %v1668_v40 = vpop.f32.mrf.mxu2 }
 0xc2d   :  { %v1669_v6 = vadd.f32 %v1847_v58, %v1668_v40 }
 0xc2f   :  { %v1674_v18 = vsub.f32 0.0, %v1669_v6 }
 0xc31   :  { %v1676_v19 = vmul.f32 1.442695, %v1674_v18 }
 0xc33   :  { %1950 = vpow2.f32 %v1676_v19 }
 0xc34   :  { %v1671_v23 = vpop.f32.mrf.mxu2 }
 0xc35   :  { %v1672_v61 = vadd.f32 %v1847_v58, %v1671_v23 }
 0xc37   :  { %v1675_v25 = vsub.f32 0.0, %v1672_v61 }
 0xc39   :  { %v1951_v9 = vpop.eup %1950  ;;  %v1678_v10 = vmul.f32 1.442695, %v1675_v25 }
 0xc3a   :  { %v1680_v13 = vadd.f32 1.0, %v1951_v9 }
 0xc3b   :  { %1952 = vpow2.f32 %v1678_v10 }
 0xc3c   :  { %1954 = vrcp.f32 %v1680_v13  ;;  %v1693_v27 = vand.u32 2147483648, %v1680_v13  ;;  %v1691_v29 = vand.u32 2147483647, %v1680_v13  ;;  %vm1687_vm11 = vweird.f32 %v1680_v13 }
 0xc3e   :  { %v1694_v0 = vor.u32 1.1754944e-38, %v1693_v27  ;;  %vm1692_vm10 = vcmp.eq.f32.partialorder %v1691_v29, 8.507059e+37 }
 0xc41   :  { %v1953_v15 = vpop.eup %1952 }
 0xc42   :  { %v1955_v20 = vpop.eup %1954  ;;  %v1681_v21 = vadd.f32 1.0, %v1953_v15 }
 0xc43   :  { %v1683_v4 = vmul.f32 %v1955_v20, %v1680_v13  ;;  %vm1688_vm6 = vweird.f32 %v1955_v20 }
 0xc44   :  { %1956 = vrcp.f32 %v1681_v21  ;;  %vm1689_vm5 = vmor %vm1687_vm11, %vm1688_vm6  ;;  %v1708_v46 = vand.u32 2147483648, %v1681_v21  ;;  %v1706_v30 = vand.u32 2147483647, %v1681_v21  ;;  %vm1702_vm3 = vweird.f32 %v1681_v21 }
 0xc45   :  { %v1684_v26 = vsub.f32 1.0, %v1683_v4 }
 0xc46   :  { %v1709_v49 = vor.u32 1.1754944e-38, %v1708_v46  ;;  %vm1707_vm0 = vcmp.eq.f32.partialorder %v1706_v30, 8.507059e+37 }
 0xc47   :  { %v1685_v28 = vmul.f32 %v1955_v20, %v1684_v26 }
 0xc49   :  { %v1686_v31 = vadd.f32 %v1955_v20, %v1685_v28 }
 0xc4a   :  { %v1957_v34 = vpop.eup %1956 }
 0xc4b   :  { %v1690_v22 = vsel %vm1689_vm5, %v1955_v20, %v1686_v31  ;;  %v1698_v45 = vmul.f32 %v1957_v34, %v1681_v21  ;;  %vm1703_vm12 = vweird.f32 %v1957_v34 }
 0xc4c   :  { %v1695_v7 = vsel %vm1692_vm10, %v1694_v0, %v1690_v22  ;;  %vm1704_vm15 = vmor %vm1702_vm3, %vm1703_vm12 }
 0xc4d   :  { %1713 = vst.msk [vmem:[%s2662_s19] sm:$0xff] %vm1712_vm7, %v1695_v7  ;;  %v1699_v35 = vsub.f32 1.0, %v1698_v45 }
 0xc4f   :  { %v1700_v36 = vmul.f32 %v1957_v34, %v1699_v35 }
 0xc51   :  { %v1701_v38 = vadd.f32 %v1957_v34, %v1700_v36 }
 0xc53   :  { %v1705_v56 = vsel %vm1704_vm15, %v1957_v34, %v1701_v38 }
 0xc54   :  { %v1710_v59 = vsel %vm1707_vm0, %v1709_v49, %v1705_v56 }
 0xc55   :  { %1714 = vst.msk [vmem:[%s2662_s19 + $0x8] sm:$0xff] %vm1712_vm7, %v1710_v59 }
 0xc56   :  { %1719 = vsyncpa [#allocation4], 1 }

</bundles_post_ra>
